<compile_context>
chip_gen: v7x
topology: tpu7x:2x2x1
jax: 0.10.0
libtpu: 0.0.40
codegen_flags: <defaults>
</compile_context>

<pallas_src>
import math

import jax
import jax.numpy as jnp
from jax import lax
from jax.experimental import pallas as pl
from jax.experimental.pallas import tpu as pltpu

IMG_SIZE = 16
NC = 1
NDF = 64
RATIO = IMG_SIZE / 64
C_EXP = math.floor(3 + math.log(RATIO, 2))   # = 1 for img_size=16
LRELU_SLOPE = 0.2
BN_EPS = 1e-5
K = 4                                        # conv kernel size

# The fused kernel below is generated for the img_size=16 instantiation.
assert C_EXP == 1, "fused kernel is specialized to c_exp == 1 (img_size=16)"


# ------------------------------ Pallas kernel --------------------------------
def _discriminator_fused_kernel(p0_ref, w0_ref, w1_ref, g1_ref, b1_ref,
                                w2_ref, o_ref):
    """Whole Discriminator forward for one batch, fully resident in VMEM.

    p0_ref : (16*N*16, K*K*NC) f32   tap-major duplicated layer-0 im2col rows
    w0_ref : (K*K*NC, NDF)     f32   layer-0 weight, (kh,kw,cin) x cout
    w1_ref : (16, NDF, 2*NDF)  bf16  layer-1 weight, one (cin,cout) slab / tap
    g1_ref : (1, 2*NDF)        f32   BatchNorm2d gamma
    b1_ref : (1, 2*NDF)        f32   BatchNorm2d beta
    w2_ref : (K*K, 2*NDF)      f32   output-conv weight, (kh,kw) x cin
    o_ref  : (N, 1)            f32   sigmoid outputs
    """
    taps = w1_ref.shape[0]                  # 16 = 4x4 taps of the layer-1 conv
    rows1 = p0_ref.shape[0] // taps         # N * Ho1 * Wo1 (layer-1 GEMM rows)

    # ---- Layer 0: Conv(nc->ndf, 4, s2, p1) + LeakyReLU(0.2) -----------------
    # One im2col GEMM; rows are ordered (tap, n, oh1, ow1) so the result is
    # already layer-1's patch matrix, split into `taps` contiguous row blocks.
    # K = nc*4*4 = 16 is tiny, so this single (mostly padded) MXU pass stays
    # in f32 - not worth moving off the MXU or repacking lanes.
    h0 = jnp.dot(p0_ref[...], w0_ref[...], preferred_element_type=jnp.float32)
    h0 = jnp.where(h0 >= 0, h0, LRELU_SLOPE * h0).astype(jnp.bfloat16)

    # ---- Layer 1: Conv(ndf->2ndf, 4, s2, p1) + BatchNorm2d + LeakyReLU ------
    # 16 accumulating bf16 (rows1,64)@(64,128) MXU matmuls (one per tap) with
    # an f32 accumulator; static contiguous sublane slices only.
    acc = jnp.dot(h0[0:rows1, :], w1_ref[0], preferred_element_type=jnp.float32)
    for t in range(1, taps):
        acc = acc + jnp.dot(h0[t * rows1:(t + 1) * rows1, :], w1_ref[t],
                            preferred_element_type=jnp.float32)
    # Training-mode batch stats over all N*H*W rows (all rows live in this one
    # block, so the per-channel reduction is exact - no cross-tile stats).
    mean = jnp.mean(acc, axis=0, keepdims=True)
    var = jnp.mean(jnp.square(acc - mean), axis=0, keepdims=True)
    h1 = (acc - mean) * lax.rsqrt(var + BN_EPS) * g1_ref[...] + b1_ref[...]
    h1 = jnp.where(h1 >= 0, h1, LRELU_SLOPE * h1)           # (N*16, 128) f32

    # ---- Layer 2: Conv(2ndf->1, 4, s1, p0) + Sigmoid -------------------------
    # Cout = 1 and the 4x4 window covers the whole 4x4 map -> plain weighted
    # sum per sample: VPU multiply + XLU reductions, no lane-sparse MXU pass.
    n_samples = o_ref.shape[0]
    rows_per_sample = h1.shape[0] // n_samples              # 16
    w2 = w2_ref[...]
    for b in range(n_samples):
        blk = h1[b * rows_per_sample:(b + 1) * rows_per_sample, :] * w2
        z = jnp.sum(jnp.sum(blk, axis=1, keepdims=True), axis=0, keepdims=True)
        o_ref[b:b + 1, :] = jax.nn.sigmoid(z).astype(o_ref.dtype)


# -------------------------------- JAX glue ------------------------------------
def _build_tap_major_patches(x_nhwc):
    """Layer-0 im2col patches, duplicated & ordered (tap, n, oh1, ow1).

    Row (t=ki*4+kj, n, oh1, ow1) holds the 4x4xNC input window feeding layer-0
    output position (2*oh1+ki-1, 2*ow1+kj-1), all-zero where that position is
    layer-1's zero padding.  Columns are (kh, kw, cin), matching the flattened
    layer-0 weight.  This is a handful of slices of the tiny network input;
    all intermediate activations stay inside the Pallas kernel (in VMEM).
    """
    n, h, w, c = x_nhwc.shape
    ho0 = (h + 2 - K) // 2 + 1          # layer-0 output size (8)
    ho1 = (ho0 + 2 - K) // 2 + 1        # layer-1 output size (4)
    xp = jnp.pad(x_nhwc, ((0, 0), (1, 1), (1, 1), (0, 0)))
    cols = []
    for kh in range(K):
        for kw in range(K):
            cols.append(xp[:, kh:kh + 2 * ho0:2, kw:kw + 2 * ho0:2, :])
    l0p = jnp.concatenate(cols, axis=-1)                      # (N, 8, 8, K*K*C)
    l0p = jnp.pad(l0p, ((0, 0), (1, 1), (1, 1), (0, 0)))      # layer-1 zero pad
    taps = []
    for ki in range(K):
        for kj in range(K):
            taps.append(l0p[:, ki:ki + 2 * ho1:2, kj:kj + 2 * ho1:2, :])
    p0 = jnp.stack(taps, axis=0)                              # (16, N, 4, 4, K*K*C)
    return p0.reshape(K * K * n * ho1 * ho1, K * K * c)


def discriminator_forward(x_nchw, params):
    """Fused Pallas forward.  x_nchw: (N, nc, 16, 16) f32 -> (N, 1, 1, 1)."""
    n = x_nchw.shape[0]
    ndf2 = NDF * 2 ** C_EXP
    x = jnp.transpose(x_nchw, (0, 2, 3, 1))                   # channels-last

    p0 = _build_tap_major_patches(x)                                        # (16*N*16, 16) f32
    w0_2d = params["w0"].transpose(2, 3, 1, 0).reshape(K * K * NC, NDF)     # (16, 64)  f32
    w1_taps = (params["w1"].transpose(2, 3, 1, 0)
               .reshape(K * K, NDF, ndf2).astype(jnp.bfloat16))             # (16, 64, 128) bf16
    g1 = params["g1"].reshape(1, ndf2)
    b1 = params["b1"].reshape(1, ndf2)
    w2_2d = params["w_out"].transpose(2, 3, 1, 0).reshape(K * K, ndf2)      # (16, 128) f32

    vmem = pl.BlockSpec(memory_space=pltpu.MemorySpace.VMEM)
    out = pl.pallas_call(
        _discriminator_fused_kernel,
        out_shape=jax.ShapeDtypeStruct((n, 1), jnp.float32),
        in_specs=[vmem] * 6,
        out_specs=vmem,
        # Single (gridless) kernel instance: the entire net (<1 MiB live data)
        # fits VMEM on v5e/v6e (128 MiB) and v7x (64 MiB).  If the batch ever
        # grows, tile rows with a "parallel" grid axis (v7x has 2 TensorCores)
        # and switch BN to a cross-tile sum / sum-of-squares reduction.
    )(p0, w0_2d, w1_taps, g1, b1, w2_2d)
    return out.reshape(n, 1, 1, 1)


def init_params(key):
    """Deterministic synthetic parameters (DCGAN N(0,0.02) conv weights; BN
    affine params slightly randomized so the affine path is exercised)."""
    ndf2 = NDF * 2 ** C_EXP
    k0, k1, k2, kg, kb = jax.random.split(key, 5)
    return {
        "w0": 0.02 * jax.random.normal(k0, (NDF, NC, K, K), jnp.float32),
        "w1": 0.02 * jax.random.normal(k1, (ndf2, NDF, K, K), jnp.float32),
        "g1": 1.0 + 0.1 * jax.random.normal(kg, (ndf2,), jnp.float32),
        "b1": 0.1 * jax.random.normal(kb, (ndf2,), jnp.float32),
        "w_out": 0.02 * jax.random.normal(k2, (1, ndf2, K, K), jnp.float32),
    }


# --------------------------- pure-JAX reference -------------------------------
def _conv_ref(x, w, stride, pad):
    return lax.conv_general_dilated(
        x, w, (stride, stride), [(pad, pad), (pad, pad)],
        dimension_numbers=("NCHW", "OIHW", "NCHW"),
        precision=lax.Precision.HIGHEST)


def forward_ref(x, params):
    h = _conv_ref(x, params["w0"], 2, 1)
    h = jnp.where(h >= 0, h, LRELU_SLOPE * h)
    h = _conv_ref(h, params["w1"], 2, 1)
    mean = h.mean(axis=(0, 2, 3), keepdims=True)
    var = jnp.square(h - mean).mean(axis=(0, 2, 3), keepdims=True)
    h = ((h - mean) * lax.rsqrt(var + BN_EPS)
         * params["g1"].reshape(1, -1, 1, 1) + params["b1"].reshape(1, -1, 1, 1))
    h = jnp.where(h >= 0, h, LRELU_SLOPE * h)
    h = _conv_ref(h, params["w_out"], 1, 0)
    return jax.nn.sigmoid(h)


if __name__ == "__main__":
    key = jax.random.PRNGKey(0)
    kx, kp = jax.random.split(key)
    x = jax.random.normal(kx, (2, NC, IMG_SIZE, IMG_SIZE), jnp.float32)
    params = init_params(kp)

    fwd = jax.jit(discriminator_forward)
    out = jax.block_until_ready(fwd(x, params))
    assert out.shape == (2, 1, 1, 1), out.shape

    ref = forward_ref(x, params)
    max_err = float(jnp.max(jnp.abs(out - ref)))
    # bf16 MXU operands (f32 accumulation, BN stats and epilogue in f32):
    # agreement vs the f32 HIGHEST-precision reference is ~1e-4..1e-3.
    assert max_err < 3e-3, f"mismatch vs reference: {max_err}"

    print("KERNEL_OK")
</pallas_src>

<mosaic_0001>
module attributes {stable_mosaic.version = 11 : i64} {
  func.func @_discriminator_fused_kernel(%arg0: memref<512x16xf32, #tpu.memory_space<vmem>>, %arg1: memref<16x64xf32, #tpu.memory_space<vmem>>, %arg2: memref<16x64x128xbf16, #tpu.memory_space<vmem>>, %arg3: memref<1x128xf32, #tpu.memory_space<vmem>>, %arg4: memref<1x128xf32, #tpu.memory_space<vmem>>, %arg5: memref<16x128xf32, #tpu.memory_space<vmem>>, %arg6: memref<2x1xf32, #tpu.memory_space<vmem>>) attributes {dimension_semantics = [], scalar_prefetch = 0 : i64, scratch_operands = 0 : i64, tpu.core_type = #tpu.core_type<tc>} {
    %c0 = arith.constant 0 : index
    %c0_0 = arith.constant 0 : index
    %0 = vector.load %arg0[%c0, %c0_0] : memref<512x16xf32, #tpu.memory_space<vmem>>, vector<512x16xf32>
    %c0_1 = arith.constant 0 : index
    %c0_2 = arith.constant 0 : index
    %1 = vector.load %arg1[%c0_1, %c0_2] : memref<16x64xf32, #tpu.memory_space<vmem>>, vector<16x64xf32>
    %cst = arith.constant dense<0.000000e+00> : vector<512x64xf32>
    %2 = tpu.matmul %0, %1, %cst {dimension_numbers = #tpu.dot_dimension_numbers<[1], [0], [0], [1], [0, 0, 1, 1], [], []>} : vector<512x16xf32>, vector<16x64xf32>, vector<512x64xf32> -> vector<512x64xf32>
    %cst_3 = arith.constant 0.000000e+00 : f32
    %3 = vector.broadcast %cst_3 : f32 to vector<512x64xf32>
    %4 = arith.cmpf oge, %2, %3 : vector<512x64xf32>
    %cst_4 = arith.constant 2.000000e-01 : f32
    %5 = vector.broadcast %cst_4 : f32 to vector<512x64xf32>
    %6 = arith.mulf %5, %2 : vector<512x64xf32>
    %7 = arith.select %4, %2, %6 : vector<512x64xi1>, vector<512x64xf32>
    %8 = arith.truncf %7 : vector<512x64xf32> to vector<512x64xbf16>
    %9 = vector.extract_strided_slice %8 {offsets = [0, 0], sizes = [32, 64], strides = [1, 1]} : vector<512x64xbf16> to vector<32x64xbf16>
    %c0_5 = arith.constant 0 : index
    %c0_6 = arith.constant 0 : index
    %c0_7 = arith.constant 0 : index
    %10 = vector.load %arg2[%c0_5, %c0_6, %c0_7] : memref<16x64x128xbf16, #tpu.memory_space<vmem>>, vector<1x64x128xbf16>
    %11 = vector.shape_cast %10 : vector<1x64x128xbf16> to vector<64x128xbf16>
    %cst_8 = arith.constant dense<0.000000e+00> : vector<32x128xf32>
    %12 = tpu.matmul %9, %11, %cst_8 {dimension_numbers = #tpu.dot_dimension_numbers<[1], [0], [0], [1], [0, 0, 1, 1], [], []>} : vector<32x64xbf16>, vector<64x128xbf16>, vector<32x128xf32> -> vector<32x128xf32>
    %13 = vector.extract_strided_slice %8 {offsets = [32, 0], sizes = [32, 64], strides = [1, 1]} : vector<512x64xbf16> to vector<32x64xbf16>
    %c1 = arith.constant 1 : index
    %c0_9 = arith.constant 0 : index
    %c0_10 = arith.constant 0 : index
    %14 = vector.load %arg2[%c1, %c0_9, %c0_10] : memref<16x64x128xbf16, #tpu.memory_space<vmem>>, vector<1x64x128xbf16>
    %15 = vector.shape_cast %14 : vector<1x64x128xbf16> to vector<64x128xbf16>
    %cst_11 = arith.constant dense<0.000000e+00> : vector<32x128xf32>
    %16 = tpu.matmul %13, %15, %cst_11 {dimension_numbers = #tpu.dot_dimension_numbers<[1], [0], [0], [1], [0, 0, 1, 1], [], []>} : vector<32x64xbf16>, vector<64x128xbf16>, vector<32x128xf32> -> vector<32x128xf32>
    %17 = arith.addf %12, %16 : vector<32x128xf32>
    %18 = vector.extract_strided_slice %8 {offsets = [64, 0], sizes = [32, 64], strides = [1, 1]} : vector<512x64xbf16> to vector<32x64xbf16>
    %c2 = arith.constant 2 : index
    %c0_12 = arith.constant 0 : index
    %c0_13 = arith.constant 0 : index
    %19 = vector.load %arg2[%c2, %c0_12, %c0_13] : memref<16x64x128xbf16, #tpu.memory_space<vmem>>, vector<1x64x128xbf16>
    %20 = vector.shape_cast %19 : vector<1x64x128xbf16> to vector<64x128xbf16>
    %cst_14 = arith.constant dense<0.000000e+00> : vector<32x128xf32>
    %21 = tpu.matmul %18, %20, %cst_14 {dimension_numbers = #tpu.dot_dimension_numbers<[1], [0], [0], [1], [0, 0, 1, 1], [], []>} : vector<32x64xbf16>, vector<64x128xbf16>, vector<32x128xf32> -> vector<32x128xf32>
    %22 = arith.addf %17, %21 : vector<32x128xf32>
    %23 = vector.extract_strided_slice %8 {offsets = [96, 0], sizes = [32, 64], strides = [1, 1]} : vector<512x64xbf16> to vector<32x64xbf16>
    %c3 = arith.constant 3 : index
    %c0_15 = arith.constant 0 : index
    %c0_16 = arith.constant 0 : index
    %24 = vector.load %arg2[%c3, %c0_15, %c0_16] : memref<16x64x128xbf16, #tpu.memory_space<vmem>>, vector<1x64x128xbf16>
    %25 = vector.shape_cast %24 : vector<1x64x128xbf16> to vector<64x128xbf16>
    %cst_17 = arith.constant dense<0.000000e+00> : vector<32x128xf32>
    %26 = tpu.matmul %23, %25, %cst_17 {dimension_numbers = #tpu.dot_dimension_numbers<[1], [0], [0], [1], [0, 0, 1, 1], [], []>} : vector<32x64xbf16>, vector<64x128xbf16>, vector<32x128xf32> -> vector<32x128xf32>
    %27 = arith.addf %22, %26 : vector<32x128xf32>
    %28 = vector.extract_strided_slice %8 {offsets = [128, 0], sizes = [32, 64], strides = [1, 1]} : vector<512x64xbf16> to vector<32x64xbf16>
    %c4 = arith.constant 4 : index
    %c0_18 = arith.constant 0 : index
    %c0_19 = arith.constant 0 : index
    %29 = vector.load %arg2[%c4, %c0_18, %c0_19] : memref<16x64x128xbf16, #tpu.memory_space<vmem>>, vector<1x64x128xbf16>
    %30 = vector.shape_cast %29 : vector<1x64x128xbf16> to vector<64x128xbf16>
    %cst_20 = arith.constant dense<0.000000e+00> : vector<32x128xf32>
    %31 = tpu.matmul %28, %30, %cst_20 {dimension_numbers = #tpu.dot_dimension_numbers<[1], [0], [0], [1], [0, 0, 1, 1], [], []>} : vector<32x64xbf16>, vector<64x128xbf16>, vector<32x128xf32> -> vector<32x128xf32>
    %32 = arith.addf %27, %31 : vector<32x128xf32>
    %33 = vector.extract_strided_slice %8 {offsets = [160, 0], sizes = [32, 64], strides = [1, 1]} : vector<512x64xbf16> to vector<32x64xbf16>
    %c5 = arith.constant 5 : index
    %c0_21 = arith.constant 0 : index
    %c0_22 = arith.constant 0 : index
    %34 = vector.load %arg2[%c5, %c0_21, %c0_22] : memref<16x64x128xbf16, #tpu.memory_space<vmem>>, vector<1x64x128xbf16>
    %35 = vector.shape_cast %34 : vector<1x64x128xbf16> to vector<64x128xbf16>
    %cst_23 = arith.constant dense<0.000000e+00> : vector<32x128xf32>
    %36 = tpu.matmul %33, %35, %cst_23 {dimension_numbers = #tpu.dot_dimension_numbers<[1], [0], [0], [1], [0, 0, 1, 1], [], []>} : vector<32x64xbf16>, vector<64x128xbf16>, vector<32x128xf32> -> vector<32x128xf32>
    %37 = arith.addf %32, %36 : vector<32x128xf32>
    %38 = vector.extract_strided_slice %8 {offsets = [192, 0], sizes = [32, 64], strides = [1, 1]} : vector<512x64xbf16> to vector<32x64xbf16>
    %c6 = arith.constant 6 : index
    %c0_24 = arith.constant 0 : index
    %c0_25 = arith.constant 0 : index
    %39 = vector.load %arg2[%c6, %c0_24, %c0_25] : memref<16x64x128xbf16, #tpu.memory_space<vmem>>, vector<1x64x128xbf16>
    %40 = vector.shape_cast %39 : vector<1x64x128xbf16> to vector<64x128xbf16>
    %cst_26 = arith.constant dense<0.000000e+00> : vector<32x128xf32>
    %41 = tpu.matmul %38, %40, %cst_26 {dimension_numbers = #tpu.dot_dimension_numbers<[1], [0], [0], [1], [0, 0, 1, 1], [], []>} : vector<32x64xbf16>, vector<64x128xbf16>, vector<32x128xf32> -> vector<32x128xf32>
    %42 = arith.addf %37, %41 : vector<32x128xf32>
    %43 = vector.extract_strided_slice %8 {offsets = [224, 0], sizes = [32, 64], strides = [1, 1]} : vector<512x64xbf16> to vector<32x64xbf16>
    %c7 = arith.constant 7 : index
    %c0_27 = arith.constant 0 : index
    %c0_28 = arith.constant 0 : index
    %44 = vector.load %arg2[%c7, %c0_27, %c0_28] : memref<16x64x128xbf16, #tpu.memory_space<vmem>>, vector<1x64x128xbf16>
    %45 = vector.shape_cast %44 : vector<1x64x128xbf16> to vector<64x128xbf16>
    %cst_29 = arith.constant dense<0.000000e+00> : vector<32x128xf32>
    %46 = tpu.matmul %43, %45, %cst_29 {dimension_numbers = #tpu.dot_dimension_numbers<[1], [0], [0], [1], [0, 0, 1, 1], [], []>} : vector<32x64xbf16>, vector<64x128xbf16>, vector<32x128xf32> -> vector<32x128xf32>
    %47 = arith.addf %42, %46 : vector<32x128xf32>
    %48 = vector.extract_strided_slice %8 {offsets = [256, 0], sizes = [32, 64], strides = [1, 1]} : vector<512x64xbf16> to vector<32x64xbf16>
    %c8 = arith.constant 8 : index
    %c0_30 = arith.constant 0 : index
    %c0_31 = arith.constant 0 : index
    %49 = vector.load %arg2[%c8, %c0_30, %c0_31] : memref<16x64x128xbf16, #tpu.memory_space<vmem>>, vector<1x64x128xbf16>
    %50 = vector.shape_cast %49 : vector<1x64x128xbf16> to vector<64x128xbf16>
    %cst_32 = arith.constant dense<0.000000e+00> : vector<32x128xf32>
    %51 = tpu.matmul %48, %50, %cst_32 {dimension_numbers = #tpu.dot_dimension_numbers<[1], [0], [0], [1], [0, 0, 1, 1], [], []>} : vector<32x64xbf16>, vector<64x128xbf16>, vector<32x128xf32> -> vector<32x128xf32>
    %52 = arith.addf %47, %51 : vector<32x128xf32>
    %53 = vector.extract_strided_slice %8 {offsets = [288, 0], sizes = [32, 64], strides = [1, 1]} : vector<512x64xbf16> to vector<32x64xbf16>
    %c9 = arith.constant 9 : index
    %c0_33 = arith.constant 0 : index
    %c0_34 = arith.constant 0 : index
    %54 = vector.load %arg2[%c9, %c0_33, %c0_34] : memref<16x64x128xbf16, #tpu.memory_space<vmem>>, vector<1x64x128xbf16>
    %55 = vector.shape_cast %54 : vector<1x64x128xbf16> to vector<64x128xbf16>
    %cst_35 = arith.constant dense<0.000000e+00> : vector<32x128xf32>
    %56 = tpu.matmul %53, %55, %cst_35 {dimension_numbers = #tpu.dot_dimension_numbers<[1], [0], [0], [1], [0, 0, 1, 1], [], []>} : vector<32x64xbf16>, vector<64x128xbf16>, vector<32x128xf32> -> vector<32x128xf32>
    %57 = arith.addf %52, %56 : vector<32x128xf32>
    %58 = vector.extract_strided_slice %8 {offsets = [320, 0], sizes = [32, 64], strides = [1, 1]} : vector<512x64xbf16> to vector<32x64xbf16>
    %c10 = arith.constant 10 : index
    %c0_36 = arith.constant 0 : index
    %c0_37 = arith.constant 0 : index
    %59 = vector.load %arg2[%c10, %c0_36, %c0_37] : memref<16x64x128xbf16, #tpu.memory_space<vmem>>, vector<1x64x128xbf16>
    %60 = vector.shape_cast %59 : vector<1x64x128xbf16> to vector<64x128xbf16>
    %cst_38 = arith.constant dense<0.000000e+00> : vector<32x128xf32>
    %61 = tpu.matmul %58, %60, %cst_38 {dimension_numbers = #tpu.dot_dimension_numbers<[1], [0], [0], [1], [0, 0, 1, 1], [], []>} : vector<32x64xbf16>, vector<64x128xbf16>, vector<32x128xf32> -> vector<32x128xf32>
    %62 = arith.addf %57, %61 : vector<32x128xf32>
    %63 = vector.extract_strided_slice %8 {offsets = [352, 0], sizes = [32, 64], strides = [1, 1]} : vector<512x64xbf16> to vector<32x64xbf16>
    %c11 = arith.constant 11 : index
    %c0_39 = arith.constant 0 : index
    %c0_40 = arith.constant 0 : index
    %64 = vector.load %arg2[%c11, %c0_39, %c0_40] : memref<16x64x128xbf16, #tpu.memory_space<vmem>>, vector<1x64x128xbf16>
    %65 = vector.shape_cast %64 : vector<1x64x128xbf16> to vector<64x128xbf16>
    %cst_41 = arith.constant dense<0.000000e+00> : vector<32x128xf32>
    %66 = tpu.matmul %63, %65, %cst_41 {dimension_numbers = #tpu.dot_dimension_numbers<[1], [0], [0], [1], [0, 0, 1, 1], [], []>} : vector<32x64xbf16>, vector<64x128xbf16>, vector<32x128xf32> -> vector<32x128xf32>
    %67 = arith.addf %62, %66 : vector<32x128xf32>
    %68 = vector.extract_strided_slice %8 {offsets = [384, 0], sizes = [32, 64], strides = [1, 1]} : vector<512x64xbf16> to vector<32x64xbf16>
    %c12 = arith.constant 12 : index
    %c0_42 = arith.constant 0 : index
    %c0_43 = arith.constant 0 : index
    %69 = vector.load %arg2[%c12, %c0_42, %c0_43] : memref<16x64x128xbf16, #tpu.memory_space<vmem>>, vector<1x64x128xbf16>
    %70 = vector.shape_cast %69 : vector<1x64x128xbf16> to vector<64x128xbf16>
    %cst_44 = arith.constant dense<0.000000e+00> : vector<32x128xf32>
    %71 = tpu.matmul %68, %70, %cst_44 {dimension_numbers = #tpu.dot_dimension_numbers<[1], [0], [0], [1], [0, 0, 1, 1], [], []>} : vector<32x64xbf16>, vector<64x128xbf16>, vector<32x128xf32> -> vector<32x128xf32>
    %72 = arith.addf %67, %71 : vector<32x128xf32>
    %73 = vector.extract_strided_slice %8 {offsets = [416, 0], sizes = [32, 64], strides = [1, 1]} : vector<512x64xbf16> to vector<32x64xbf16>
    %c13 = arith.constant 13 : index
    %c0_45 = arith.constant 0 : index
    %c0_46 = arith.constant 0 : index
    %74 = vector.load %arg2[%c13, %c0_45, %c0_46] : memref<16x64x128xbf16, #tpu.memory_space<vmem>>, vector<1x64x128xbf16>
    %75 = vector.shape_cast %74 : vector<1x64x128xbf16> to vector<64x128xbf16>
    %cst_47 = arith.constant dense<0.000000e+00> : vector<32x128xf32>
    %76 = tpu.matmul %73, %75, %cst_47 {dimension_numbers = #tpu.dot_dimension_numbers<[1], [0], [0], [1], [0, 0, 1, 1], [], []>} : vector<32x64xbf16>, vector<64x128xbf16>, vector<32x128xf32> -> vector<32x128xf32>
    %77 = arith.addf %72, %76 : vector<32x128xf32>
    %78 = vector.extract_strided_slice %8 {offsets = [448, 0], sizes = [32, 64], strides = [1, 1]} : vector<512x64xbf16> to vector<32x64xbf16>
    %c14 = arith.constant 14 : index
    %c0_48 = arith.constant 0 : index
    %c0_49 = arith.constant 0 : index
    %79 = vector.load %arg2[%c14, %c0_48, %c0_49] : memref<16x64x128xbf16, #tpu.memory_space<vmem>>, vector<1x64x128xbf16>
    %80 = vector.shape_cast %79 : vector<1x64x128xbf16> to vector<64x128xbf16>
    %cst_50 = arith.constant dense<0.000000e+00> : vector<32x128xf32>
    %81 = tpu.matmul %78, %80, %cst_50 {dimension_numbers = #tpu.dot_dimension_numbers<[1], [0], [0], [1], [0, 0, 1, 1], [], []>} : vector<32x64xbf16>, vector<64x128xbf16>, vector<32x128xf32> -> vector<32x128xf32>
    %82 = arith.addf %77, %81 : vector<32x128xf32>
    %83 = vector.extract_strided_slice %8 {offsets = [480, 0], sizes = [32, 64], strides = [1, 1]} : vector<512x64xbf16> to vector<32x64xbf16>
    %c15 = arith.constant 15 : index
    %c0_51 = arith.constant 0 : index
    %c0_52 = arith.constant 0 : index
    %84 = vector.load %arg2[%c15, %c0_51, %c0_52] : memref<16x64x128xbf16, #tpu.memory_space<vmem>>, vector<1x64x128xbf16>
    %85 = vector.shape_cast %84 : vector<1x64x128xbf16> to vector<64x128xbf16>
    %cst_53 = arith.constant dense<0.000000e+00> : vector<32x128xf32>
    %86 = tpu.matmul %83, %85, %cst_53 {dimension_numbers = #tpu.dot_dimension_numbers<[1], [0], [0], [1], [0, 0, 1, 1], [], []>} : vector<32x64xbf16>, vector<64x128xbf16>, vector<32x128xf32> -> vector<32x128xf32>
    %87 = arith.addf %82, %86 : vector<32x128xf32>
    %cst_54 = arith.constant dense<0.000000e+00> : vector<128xf32>
    %88 = vector.multi_reduction <add>, %87, %cst_54 [0] : vector<32x128xf32> to vector<128xf32>
    %89 = vector.shape_cast %88 : vector<128xf32> to vector<1x128xf32>
    %cst_55 = arith.constant 3.200000e+01 : f32
    %90 = vector.broadcast %cst_55 : f32 to vector<1x128xf32>
    %91 = arith.divf %89, %90 : vector<1x128xf32>
    %92 = vector.broadcast %91 : vector<1x128xf32> to vector<32x128xf32>
    %93 = arith.subf %87, %92 : vector<32x128xf32>
    %94 = arith.mulf %93, %93 : vector<32x128xf32>
    %cst_56 = arith.constant dense<0.000000e+00> : vector<128xf32>
    %95 = vector.multi_reduction <add>, %94, %cst_56 [0] : vector<32x128xf32> to vector<128xf32>
    %96 = vector.shape_cast %95 : vector<128xf32> to vector<1x128xf32>
    %cst_57 = arith.constant 3.200000e+01 : f32
    %97 = vector.broadcast %cst_57 : f32 to vector<1x128xf32>
    %98 = arith.divf %96, %97 : vector<1x128xf32>
    %99 = vector.broadcast %91 : vector<1x128xf32> to vector<32x128xf32>
    %100 = arith.subf %87, %99 : vector<32x128xf32>
    %cst_58 = arith.constant 9.99999974E-6 : f32
    %101 = vector.broadcast %cst_58 : f32 to vector<1x128xf32>
    %102 = arith.addf %98, %101 : vector<1x128xf32>
    %103 = math.rsqrt %102 : vector<1x128xf32>
    %104 = vector.broadcast %103 : vector<1x128xf32> to vector<32x128xf32>
    %105 = arith.mulf %100, %104 : vector<32x128xf32>
    %c0_59 = arith.constant 0 : index
    %c0_60 = arith.constant 0 : index
    %106 = vector.load %arg3[%c0_59, %c0_60] : memref<1x128xf32, #tpu.memory_space<vmem>>, vector<1x128xf32>
    %107 = vector.broadcast %106 : vector<1x128xf32> to vector<32x128xf32>
    %108 = arith.mulf %105, %107 : vector<32x128xf32>
    %c0_61 = arith.constant 0 : index
    %c0_62 = arith.constant 0 : index
    %109 = vector.load %arg4[%c0_61, %c0_62] : memref<1x128xf32, #tpu.memory_space<vmem>>, vector<1x128xf32>
    %110 = vector.broadcast %109 : vector<1x128xf32> to vector<32x128xf32>
    %111 = arith.addf %108, %110 : vector<32x128xf32>
    %cst_63 = arith.constant 0.000000e+00 : f32
    %112 = vector.broadcast %cst_63 : f32 to vector<32x128xf32>
    %113 = arith.cmpf oge, %111, %112 : vector<32x128xf32>
    %cst_64 = arith.constant 2.000000e-01 : f32
    %114 = vector.broadcast %cst_64 : f32 to vector<32x128xf32>
    %115 = arith.mulf %114, %111 : vector<32x128xf32>
    %116 = arith.select %113, %111, %115 : vector<32x128xi1>, vector<32x128xf32>
    %c0_65 = arith.constant 0 : index
    %c0_66 = arith.constant 0 : index
    %117 = vector.load %arg5[%c0_65, %c0_66] : memref<16x128xf32, #tpu.memory_space<vmem>>, vector<16x128xf32>
    %118 = vector.extract_strided_slice %116 {offsets = [0, 0], sizes = [16, 128], strides = [1, 1]} : vector<32x128xf32> to vector<16x128xf32>
    %119 = arith.mulf %118, %117 : vector<16x128xf32>
    %cst_67 = arith.constant dense<0.000000e+00> : vector<16xf32>
    %120 = vector.multi_reduction <add>, %119, %cst_67 [1] : vector<16x128xf32> to vector<16xf32>
    %121 = vector.shape_cast %120 : vector<16xf32> to vector<16x1xf32>
    %cst_68 = arith.constant dense<0.000000e+00> : vector<1xf32>
    %122 = vector.multi_reduction <add>, %121, %cst_68 [0] : vector<16x1xf32> to vector<1xf32>
    %123 = vector.shape_cast %122 : vector<1xf32> to vector<1x1xf32>
    %124 = arith.negf %123 : vector<1x1xf32>
    %125 = math.exp %124 : vector<1x1xf32>
    %cst_69 = arith.constant 1.000000e+00 : f32
    %126 = vector.broadcast %cst_69 : f32 to vector<1x1xf32>
    %127 = arith.addf %126, %125 : vector<1x1xf32>
    %128 = arith.divf %126, %127 : vector<1x1xf32>
    %c0_70 = arith.constant 0 : index
    %c0_71 = arith.constant 0 : index
    %129 = vector.load %arg6[%c0_70, %c0_71] : memref<2x1xf32, #tpu.memory_space<vmem>>, vector<1x1xf32>
    tpu.vector_store %arg6[%c0_70, %c0_71], %128 {strides = array<i32>} : memref<2x1xf32, #tpu.memory_space<vmem>>, vector<1x1xf32>,
    %130 = vector.extract_strided_slice %116 {offsets = [16, 0], sizes = [16, 128], strides = [1, 1]} : vector<32x128xf32> to vector<16x128xf32>
    %131 = arith.mulf %130, %117 : vector<16x128xf32>
    %cst_72 = arith.constant dense<0.000000e+00> : vector<16xf32>
    %132 = vector.multi_reduction <add>, %131, %cst_72 [1] : vector<16x128xf32> to vector<16xf32>
    %133 = vector.shape_cast %132 : vector<16xf32> to vector<16x1xf32>
    %cst_73 = arith.constant dense<0.000000e+00> : vector<1xf32>
    %134 = vector.multi_reduction <add>, %133, %cst_73 [0] : vector<16x1xf32> to vector<1xf32>
    %135 = vector.shape_cast %134 : vector<1xf32> to vector<1x1xf32>
    %136 = arith.negf %135 : vector<1x1xf32>
    %137 = math.exp %136 : vector<1x1xf32>
    %cst_74 = arith.constant 1.000000e+00 : f32
    %138 = vector.broadcast %cst_74 : f32 to vector<1x1xf32>
    %139 = arith.addf %138, %137 : vector<1x1xf32>
    %140 = arith.divf %138, %139 : vector<1x1xf32>
    %c1_75 = arith.constant 1 : index
    %c0_76 = arith.constant 0 : index
    %141 = vector.load %arg6[%c1_75, %c0_76] : memref<2x1xf32, #tpu.memory_space<vmem>>, vector<1x1xf32>
    tpu.vector_store %arg6[%c1_75, %c0_76], %140 {strides = array<i32>} : memref<2x1xf32, #tpu.memory_space<vmem>>, vector<1x1xf32>,
    return
  }
}

</mosaic_0001>

<bundles_post_ra>
// kernel: discriminator_forward.1
= control target key start
LH: loop header
LB: loop body
LE: loop exit
PB: predicated region body
PF: predicated region fallthrough
CT: control target
= control target key end

     0   :  { %vm90_vm0 = vcmask 130048   ;;  %vm933_vm7 = vcmask 523264   ;;  %s4093_s1 = inlined_call_operand.vmem [shape: f32[16,64], index: 1, kind: input, shape index: {}]   ;;  %s4094_s0 = inlined_call_operand.vmem [shape: f32[512,16], index: 0, kind: input, shape index: {}]   ;;  %s4095_s2 = inlined_call_operand.vmem [shape: bf16[16,64,128], index: 2, kind: input, shape index: {}]   ;;  %s4096_s3 = inlined_call_operand.vmem [shape: f32[1,128], index: 3, kind: input, shape index: {}]   ;;  %s4097_s4 = inlined_call_operand.vmem [shape: f32[1,128], index: 4, kind: input, shape index: {}]   ;;  %s4098_s5 = inlined_call_operand.vmem [shape: f32[16,128], index: 5, kind: input, shape index: {}]   ;;  %s4099_s6 = inlined_call_operand.vmem [shape: f32[2,1], index: 6, kind: output, shape index: {}]  }
   0x1   :  { %v88_v0 = vld [vmem:[%s4093_s1] sm:$0xff]  ;;  %v89_v1 = vld [vmem:[%s4093_s1 + $0x8] sm:$0xff]  ;;  %v26_v5 = vld [vmem:[%s4094_s0 + $0x10] sm:$0xff] }
   0x2   :  { %v24_v2 = vld [vmem:[%s4094_s0] sm:$0xff]  ;;  %v3210_v3 = vpack.c.bf16 %v89_v1, %v88_v0  ;;  %v25_v4 = vld [vmem:[%s4094_s0 + $0x8] sm:$0xff]  ;;  %v27_v6 = vld [vmem:[%s4094_s0 + $0x18] sm:$0xff] }
   0x3   :  { %2922 = vmatprep.mubr.msk.f32.mxu0 %vm90_vm0, %v24_v2  ;;  %v28_v7 = vld [vmem:[%s4094_s0 + $0x20] sm:$0xff]  ;;  %v29_v8 = vld [vmem:[%s4094_s0 + $0x28] sm:$0xff]  ;;  %v30_v9 = vld [vmem:[%s4094_s0 + $0x30] sm:$0xff] }
   0x4   :  { %3211 = vmatprep.subr.bf16.mxu0 %v3210_v3  ;;  %v31_v10 = vld [vmem:[%s4094_s0 + $0x38] sm:$0xff]  ;;  %v32_v11 = vld [vmem:[%s4094_s0 + $0x40] sm:$0xff]  ;;  %v33_v12 = vld [vmem:[%s4094_s0 + $0x48] sm:$0xff] }
   0x5   :  { %3213 = vmatpush3.bf16.msra.mxu0 %v3210_v3  ;;  %v34_v13 = vld [vmem:[%s4094_s0 + $0x50] sm:$0xff]  ;;  %v35_v14 = vld [vmem:[%s4094_s0 + $0x58] sm:$0xff]  ;;  %v36_v15 = vld [vmem:[%s4094_s0 + $0x60] sm:$0xff] }
   0x6   :  { %v37_v16 = vld [vmem:[%s4094_s0 + $0x68] sm:$0xff]  ;;  %v38_v17 = vld [vmem:[%s4094_s0 + $0x70] sm:$0xff]  ;;  %v39_v18 = vld [vmem:[%s4094_s0 + $0x78] sm:$0xff] }
   0x7   :  { %v40_v19 = vld [vmem:[%s4094_s0 + $0x80] sm:$0xff]  ;;  %v41_v20 = vld [vmem:[%s4094_s0 + $0x88] sm:$0xff]  ;;  %v42_v21 = vld [vmem:[%s4094_s0 + $0x90] sm:$0xff] }
   0x8   :  { %2923 = vmatmul.mubr.msk.f32.vlgmr.msra.gmra.mrb[0].mxu0 %vm90_vm0, %v25_v4  ;;  %v43_v22 = vld [vmem:[%s4094_s0 + $0x98] sm:$0xff]  ;;  %v44_v23 = vld [vmem:[%s4094_s0 + $0xa0] sm:$0xff]  ;;  %v45_v24 = vld [vmem:[%s4094_s0 + $0xa8] sm:$0xff] }
   0x9   :  { %2925 = vmatprep.mubr.msk.f32.mxu0 %vm90_vm0, %v26_v5  ;;  %v46_v25 = vld [vmem:[%s4094_s0 + $0xb0] sm:$0xff]  ;;  %v47_v26 = vld [vmem:[%s4094_s0 + $0xb8] sm:$0xff]  ;;  %v48_v27 = vld [vmem:[%s4094_s0 + $0xc0] sm:$0xff] }
   0xa   :  { %v49_v28 = vld [vmem:[%s4094_s0 + $0xc8] sm:$0xff]  ;;  %v50_v29 = vld [vmem:[%s4094_s0 + $0xd0] sm:$0xff]  ;;  %v51_v30 = vld [vmem:[%s4094_s0 + $0xd8] sm:$0xff] }
   0xb   :  { %v52_v31 = vld [vmem:[%s4094_s0 + $0xe0] sm:$0xff]  ;;  %v53_v32 = vld [vmem:[%s4094_s0 + $0xe8] sm:$0xff]  ;;  %v54_v33 = vld [vmem:[%s4094_s0 + $0xf0] sm:$0xff] }
   0xc   :  { %2926 = vmatmul.mubr.msk.f32.gmra.mrb[2].mxu0 %vm90_vm0, %v27_v6  ;;  %v55_v34 = vld [vmem:[%s4094_s0 + $0xf8] sm:$0xff]  ;;  %v56_v35 = vld [vmem:[%s4094_s0 + $0x100] sm:$0xff]  ;;  %v57_v36 = vld [vmem:[%s4094_s0 + $0x108] sm:$0xff] }
   0xd   :  { %2928 = vmatprep.mubr.msk.f32.mxu0 %vm90_vm0, %v28_v7  ;;  %v58_v37 = vld [vmem:[%s4094_s0 + $0x110] sm:$0xff]  ;;  %v59_v38 = vld [vmem:[%s4094_s0 + $0x118] sm:$0xff]  ;;  %v60_v39 = vld [vmem:[%s4094_s0 + $0x120] sm:$0xff] }
   0xe   :  { %v61_v40 = vld [vmem:[%s4094_s0 + $0x128] sm:$0xff]  ;;  %v62_v41 = vld [vmem:[%s4094_s0 + $0x130] sm:$0xff]  ;;  %v63_v42 = vld [vmem:[%s4094_s0 + $0x138] sm:$0xff] }
   0xf   :  { %v64_v43 = vld [vmem:[%s4094_s0 + $0x140] sm:$0xff]  ;;  %v65_v44 = vld [vmem:[%s4094_s0 + $0x148] sm:$0xff]  ;;  %v66_v45 = vld [vmem:[%s4094_s0 + $0x150] sm:$0xff] }
  0x10   :  { %2929 = vmatmul.mubr.msk.f32.gmra.mrb[4].mxu0 %vm90_vm0, %v29_v8  ;;  %v67_v46 = vld [vmem:[%s4094_s0 + $0x158] sm:$0xff]  ;;  %v68_v47 = vld [vmem:[%s4094_s0 + $0x160] sm:$0xff]  ;;  %v69_v48 = vld [vmem:[%s4094_s0 + $0x168] sm:$0xff] }
  0x11   :  { %2931 = vmatprep.mubr.msk.f32.mxu0 %vm90_vm0, %v30_v9  ;;  %v3274_v49 = vld [vmem:[%s4095_s2 + $0x20] sm:$0xff]   ;;  %v70_v50 = vld [vmem:[%s4094_s0 + $0x170] sm:$0xff]  ;;  %v71_v51 = vld [vmem:[%s4094_s0 + $0x178] sm:$0xff] }
  0x12   :  { %3018 = vmatprep.subr.bf16.mxu0 %v3274_v49  ;;  %v3275_v52 = vld [vmem:[%s4095_s2 + $0x28] sm:$0xff]   ;;  %v72_v53 = vld [vmem:[%s4094_s0 + $0x180] sm:$0xff]  ;;  %v3276_v55 = vld [vmem:[%s4095_s2 + $0x30] sm:$0xff]  }
  0x13   :  { %3019 = vmatpush3.bf16.msra.mxu0 %v3274_v49  ;;  %v73_v54 = vld [vmem:[%s4094_s0 + $0x188] sm:$0xff]  ;;  %v74_v56 = vld [vmem:[%s4094_s0 + $0x190] sm:$0xff]  ;;  %v75_v57 = vld [vmem:[%s4094_s0 + $0x198] sm:$0xff] }
  0x14   :  { %2932 = vmatmul.mubr.msk.f32.gmra.mrb[6].mxu0 %vm90_vm0, %v31_v10  ;;  %3020 = vmatprep.subr.bf16.mxu0 %v3275_v52  ;;  %v3277_v58 = vld [vmem:[%s4095_s2 + $0x38] sm:$0xff]   ;;  %v76_v59 = vld [vmem:[%s4094_s0 + $0x1a0] sm:$0xff]  ;;  %v77_v60 = vld [vmem:[%s4094_s0 + $0x1a8] sm:$0xff] }
  0x15   :  { %2934 = vmatprep.mubr.msk.f32.mxu0 %vm90_vm0, %v32_v11  ;;  %v3617_v61 = vld [vmem:[%s4095_s2] sm:$0xff]   ;;  %v78_v62 = vld [vmem:[%s4094_s0 + $0x1b0] sm:$0xff]  ;;  %v79_v63 = vld [vmem:[%s4094_s0 + $0x1b8] sm:$0xff] }
  0x16   :  { %v80_v0 = vld [vmem:[%s4094_s0 + $0x1c0] sm:$0xff]  ;;  %v81_v1 = vld [vmem:[%s4094_s0 + $0x1c8] sm:$0xff]  ;;  %v82_v2 = vld [vmem:[%s4094_s0 + $0x1d0] sm:$0xff] }
  0x17   :  { %3021 = vmatpush3.bf16.msra.mxu0 %v3275_v52  ;;  %v3281_v3 = vld [vmem:[%s4095_s2 + $0x80] sm:$0xff]   ;;  %v83_v4 = vld [vmem:[%s4094_s0 + $0x1d8] sm:$0xff]  ;;  %v3283_v6 = vld [vmem:[%s4095_s2 + $0x88] sm:$0xff]  }
  0x18   :  { %2935 = vmatmul.mubr.msk.f32.gmra.mrb[8].mxu0 %vm90_vm0, %v33_v12  ;;  %3022 = vmatprep.subr.bf16.mxu0 %v3276_v55  ;;  %v84_v5 = vld [vmem:[%s4094_s0 + $0x1e0] sm:$0xff]  ;;  %v85_v7 = vld [vmem:[%s4094_s0 + $0x1e8] sm:$0xff]  ;;  %v86_v8 = vld [vmem:[%s4094_s0 + $0x1f0] sm:$0xff] }
  0x19   :  { %2937 = vmatprep.mubr.msk.f32.mxu0 %vm90_vm0, %v34_v13  ;;  %3066 = vmatprep.subr.bf16.mxu1 %v3281_v3  ;;  %v3285_v9 = vld [vmem:[%s4095_s2 + $0x90] sm:$0xff]   ;;  %v87_v10 = vld [vmem:[%s4094_s0 + $0x1f8] sm:$0xff]  ;;  %v3678_v12 = vld [vmem:[%s4095_s2 + $0xa0] sm:$0xff]  }
  0x1a   :  { %3067 = vmatpush3.bf16.msra.mxu1 %v3281_v3  ;;  %v3287_v11 = vld [vmem:[%s4095_s2 + $0x98] sm:$0xff]   ;;  %v3280_v52 = vld [vmem:[%s4095_s2 + $0x10] sm:$0xff]  }
  0x1b   :  { %3023 = vmatpush3.bf16.msra.mxu0 %v3276_v55  ;;  %3068 = vmatprep.subr.bf16.mxu1 %v3283_v6 }
  0x1c   :  { %2938 = vmatmul.mubr.msk.f32.gmra.mrb[10].mxu0 %vm90_vm0, %v35_v14  ;;  %3024 = vmatprep.subr.bf16.mxu0 %v3277_v58 }
  0x1d   :  { %2940 = vmatprep.mubr.msk.f32.mxu0 %vm90_vm0, %v36_v15 }
  0x1e   :  { %3069 = vmatpush3.bf16.msra.mxu1 %v3283_v6 }
  0x1f   :  { %3025 = vmatpush3.bf16.msra.mxu0 %v3277_v58  ;;  %3070 = vmatprep.subr.bf16.mxu1 %v3285_v9 }
  0x20   :  { %2941 = vmatmul.mubr.msk.f32.gmra.mrb[12].mxu0 %vm90_vm0, %v37_v16  ;;  %3030 = vmatprep.subr.bf16.mxu0 %v3617_v61 }
  0x21   :  { %2943 = vmatprep.mubr.msk.f32.mxu0 %vm90_vm0, %v38_v17 }
  0x22   :  { %3071 = vmatpush3.bf16.msra.mxu1 %v3285_v9 }
  0x23   :  { %3072 = vmatprep.subr.bf16.mxu1 %v3287_v11 }
  0x24   :  { %2944 = vmatmul.mubr.msk.f32.gmra.mrb[14].mxu0 %vm90_vm0, %v39_v18 }
  0x25   :  { %2946 = vmatprep.mubr.msk.f32.mxu0 %vm90_vm0, %v40_v19 }
  0x26   :  { %3073 = vmatpush3.bf16.msra.mxu1 %v3287_v11 }
  0x27   :  { %3078 = vmatprep.subr.bf16.mxu1 %v3678_v12 }
  0x28   :  { %2947 = vmatmul.mubr.msk.f32.gmra.mrb[16].mxu0 %vm90_vm0, %v41_v20 }
  0x29   :  { %2949 = vmatprep.mubr.msk.f32.mxu0 %vm90_vm0, %v42_v21 }
  0x2c   :  { %2950 = vmatmul.mubr.msk.f32.gmra.mrb[18].mxu0 %vm90_vm0, %v43_v22 }
  0x2d   :  { %2952 = vmatprep.mubr.msk.f32.mxu0 %vm90_vm0, %v44_v23 }
  0x30   :  { %2953 = vmatmul.mubr.msk.f32.gmra.mrb[20].mxu0 %vm90_vm0, %v45_v24 }
  0x31   :  { %2955 = vmatprep.mubr.msk.f32.mxu0 %vm90_vm0, %v46_v25 }
  0x34   :  { %2956 = vmatmul.mubr.msk.f32.gmra.mrb[22].mxu0 %vm90_vm0, %v47_v26 }
  0x35   :  { %2958 = vmatprep.mubr.msk.f32.mxu0 %vm90_vm0, %v48_v27 }
  0x38   :  { %2959 = vmatmul.mubr.msk.f32.gmra.mrb[24].mxu0 %vm90_vm0, %v49_v28 }
  0x39   :  { %2961 = vmatprep.mubr.msk.f32.mxu0 %vm90_vm0, %v50_v29 }
  0x3c   :  { %2962 = vmatmul.mubr.msk.f32.gmra.mrb[26].mxu0 %vm90_vm0, %v51_v30 }
  0x3d   :  { %2964 = vmatprep.mubr.msk.f32.mxu0 %vm90_vm0, %v52_v31 }
  0x40   :  { %2965 = vmatmul.mubr.msk.f32.gmra.mrb[28].mxu0 %vm90_vm0, %v53_v32 }
  0x41   :  { %2967 = vmatprep.mubr.msk.f32.mxu0 %vm90_vm0, %v54_v33 }
  0x44   :  { %2968 = vmatmul.mubr.msk.f32.gmra.mrb[30].mxu0 %vm90_vm0, %v55_v34 }
  0x45   :  { %2970 = vmatprep.mubr.msk.f32.mxu0 %vm90_vm0, %v56_v35 }
  0x48   :  { %2971 = vmatmul.mubr.msk.f32.gmra.mrb[32].mxu0 %vm90_vm0, %v57_v36 }
  0x49   :  { %2973 = vmatprep.mubr.msk.f32.mxu0 %vm90_vm0, %v58_v37 }
  0x4c   :  { %2974 = vmatmul.mubr.msk.f32.gmra.mrb[34].mxu0 %vm90_vm0, %v59_v38 }
  0x4d   :  { %2976 = vmatprep.mubr.msk.f32.mxu0 %vm90_vm0, %v60_v39 }
  0x50   :  { %2977 = vmatmul.mubr.msk.f32.gmra.mrb[36].mxu0 %vm90_vm0, %v61_v40 }
  0x51   :  { %2979 = vmatprep.mubr.msk.f32.mxu0 %vm90_vm0, %v62_v41 }
  0x54   :  { %2980 = vmatmul.mubr.msk.f32.gmra.mrb[38].mxu0 %vm90_vm0, %v63_v42 }
  0x55   :  { %2982 = vmatprep.mubr.msk.f32.mxu0 %vm90_vm0, %v64_v43 }
  0x58   :  { %2983 = vmatmul.mubr.msk.f32.gmra.mrb[40].mxu0 %vm90_vm0, %v65_v44  ;;  %v3279_v44 = vld [vmem:[%s4095_s2 + $0x8] sm:$0xff]  }
  0x59   :  { %2985 = vmatprep.mubr.msk.f32.mxu0 %vm90_vm0, %v66_v45 }
  0x5c   :  { %2986 = vmatmul.mubr.msk.f32.gmra.mrb[42].mxu0 %vm90_vm0, %v67_v46 }
  0x5d   :  { %2988 = vmatprep.mubr.msk.f32.mxu0 %vm90_vm0, %v68_v47 }
  0x60   :  { %2989 = vmatmul.mubr.msk.f32.gmra.mrb[44].mxu0 %vm90_vm0, %v69_v48 }
  0x61   :  { %2991 = vmatprep.mubr.msk.f32.mxu0 %vm90_vm0, %v70_v50 }
  0x64   :  { %2992 = vmatmul.mubr.msk.f32.gmra.mrb[46].mxu0 %vm90_vm0, %v71_v51 }
  0x65   :  { %2994 = vmatprep.mubr.msk.f32.mxu0 %vm90_vm0, %v72_v53 }
  0x68   :  { %2995 = vmatmul.mubr.msk.f32.gmra.mrb[48].mxu0 %vm90_vm0, %v73_v54 }
  0x69   :  { %2997 = vmatprep.mubr.msk.f32.mxu0 %vm90_vm0, %v74_v56 }
  0x6c   :  { %2998 = vmatmul.mubr.msk.f32.gmra.mrb[50].mxu0 %vm90_vm0, %v75_v57 }
  0x6d   :  { %3000 = vmatprep.mubr.msk.f32.mxu0 %vm90_vm0, %v76_v59 }
  0x70   :  { %3001 = vmatmul.mubr.msk.f32.gmra.mrb[52].mxu0 %vm90_vm0, %v77_v60  ;;  %v3282_v60 = vld [vmem:[%s4095_s2 + $0x18] sm:$0xff]  }
  0x71   :  { %3003 = vmatprep.mubr.msk.f32.mxu0 %vm90_vm0, %v78_v62 }
  0x74   :  { %3004 = vmatmul.mubr.msk.f32.gmra.mrb[54].mxu0 %vm90_vm0, %v79_v63 }
  0x75   :  { %3006 = vmatprep.mubr.msk.f32.mxu0 %vm90_vm0, %v80_v0 }
  0x78   :  { %3007 = vmatmul.mubr.msk.f32.gmra.mrb[56].mxu0 %vm90_vm0, %v81_v1 }
  0x79   :  { %3009 = vmatprep.mubr.msk.f32.mxu0 %vm90_vm0, %v82_v2 }
  0x7c   :  { %3010 = vmatmul.mubr.msk.f32.gmra.mrb[58].mxu0 %vm90_vm0, %v83_v4  ;;  %v3284_v4 = vld [vmem:[%s4095_s2 + $0x40] sm:$0xff]  }
  0x7d   :  { %3012 = vmatprep.mubr.msk.f32.mxu0 %vm90_vm0, %v84_v5 }
  0x80   :  { %3013 = vmatmul.mubr.msk.f32.gmra.mrb[60].mxu0 %vm90_vm0, %v85_v7 }
  0x81   :  { %3015 = vmatprep.mubr.msk.f32.mxu0 %vm90_vm0, %v86_v8 }
  0x84   :  { %3016 = vmatmul.mubr.msk.f32.gmra.mrb[62].mxu0 %vm90_vm0, %v87_v10 }
  0xdb   :  { %v2924_v13 = vpop.f32.mrb[0].mxu0 }
  0xdc   :  { %vm669_vm1 = vcmp.ge.f32.partialorder %v2924_v13, 0.0  ;;  %v733_v14 = vmul.f32 0.2, %v2924_v13  ;;  %v349_v15 = vpop.f32.mrb[1].mxu0 }
  0xdd   :  { %vm668_vm2 = vcmp.ge.f32.partialorder %v349_v15, 0.0  ;;  %v732_v16 = vmul.f32 0.2, %v349_v15 }
  0xde   :  { %v797_v17 = vsel %vm669_vm1, %v2924_v13, %v733_v14  ;;  %v3286_v13 = vld [vmem:[%s4095_s2 + $0x48] sm:$0xff]  }
  0xdf   :  { %v796_v18 = vsel %vm668_vm2, %v349_v15, %v732_v16  ;;  %v2927_v19 = vpop.f32.mrb[2].mxu0 }
  0xe0   :  { %v860_v20 = vpack.c.bf16 %v797_v17, %v796_v18  ;;  %vm671_vm3 = vcmp.ge.f32.partialorder %v2927_v19, 0.0  ;;  %v735_v21 = vmul.f32 0.2, %v2927_v19  ;;  %v359_v22 = vpop.f32.mrb[3].mxu0 }
  0xe1   :  { %vm670_vm4 = vcmp.ge.f32.partialorder %v359_v22, 0.0  ;;  %v734_v23 = vmul.f32 0.2, %v359_v22 }
  0xe2   :  { %v3681_v24 = vsel %vm671_vm3, %v2927_v19, %v735_v21  ;;  %v3288_v21 = vld [vmem:[%s4095_s2 + $0x50] sm:$0xff]  }
  0xe3   :  { %v3683_v25 = vsel %vm670_vm4, %v359_v22, %v734_v23  ;;  %v2930_v26 = vpop.f32.mrb[4].mxu0 }
  0xe4   :  { %v861_v27 = vpack.c.bf16 %v3681_v24, %v3683_v25  ;;  %vm673_vm5 = vcmp.ge.f32.partialorder %v2930_v26, 0.0  ;;  %v737_v28 = vmul.f32 0.2, %v2930_v26  ;;  %v369_v29 = vpop.f32.mrb[5].mxu0 }
  0xe5   :  { %vm672_vm6 = vcmp.ge.f32.partialorder %v369_v29, 0.0  ;;  %v736_v30 = vmul.f32 0.2, %v369_v29 }
  0xe6   :  { %v801_v31 = vsel %vm673_vm5, %v2930_v26, %v737_v28 }
  0xe7   :  { %v800_v32 = vsel %vm672_vm6, %v369_v29, %v736_v30  ;;  %v2933_v33 = vpop.f32.mrb[6].mxu0  ;;  %v3290_v29 = vld [vmem:[%s4095_s2 + $0x58] sm:$0xff]   ;;  %v3291_v30 = vld [vmem:[%s4095_s2 + $0xa8] sm:$0xff]  }
  0xe8   :  { %v862_v34 = vpack.c.bf16 %v801_v31, %v800_v32  ;;  %vm675_vm8 = vcmp.ge.f32.partialorder %v2933_v33, 0.0  ;;  %v739_v35 = vmul.f32 0.2, %v2933_v33  ;;  %v379_v36 = vpop.f32.mrb[7].mxu0 }
  0xe9   :  { %vm674_vm9 = vcmp.ge.f32.partialorder %v379_v36, 0.0  ;;  %v738_v37 = vmul.f32 0.2, %v379_v36 }
  0xea   :  { %v803_v38 = vsel %vm675_vm8, %v2933_v33, %v739_v35  ;;  %3026 = vmatprep.mubr.msk.bf16.mxu0 %vm933_vm7, %v862_v34 }
  0xeb   :  { %v802_v39 = vsel %vm674_vm9, %v379_v36, %v738_v37  ;;  %v2936_v40 = vpop.f32.mrb[8].mxu0 }
  0xec   :  { %v863_v41 = vpack.c.bf16 %v803_v38, %v802_v39  ;;  %vm677_vm10 = vcmp.ge.f32.partialorder %v2936_v40, 0.0  ;;  %v741_v42 = vmul.f32 0.2, %v2936_v40  ;;  %v389_v43 = vpop.f32.mrb[9].mxu0  ;;  %v3292_v38 = vld [vmem:[%s4095_s2 + $0x60] sm:$0xff]   ;;  %v3293_v39 = vld [vmem:[%s4095_s2 + $0xb0] sm:$0xff]  }
  0xed   :  { %vm676_vm11 = vcmp.ge.f32.partialorder %v389_v43, 0.0  ;;  %v740_v45 = vmul.f32 0.2, %v389_v43 }
  0xee   :  { %v805_v46 = vsel %vm677_vm10, %v2936_v40, %v741_v42  ;;  %3027 = vmatmul.mubr.msk.bf16.vlgmr.msra.gmra.mrb[64].mxu0 %vm933_vm7, %v863_v41 }
  0xef   :  { %v804_v47 = vsel %vm676_vm11, %v389_v43, %v740_v45  ;;  %3031 = vmatpush3.bf16.msra.mxu0 %v3617_v61  ;;  %v2939_v48 = vpop.f32.mrb[10].mxu0  ;;  %3038 = vmatprep.mubr.msk.bf16.mxu0 %vm933_vm7, %v860_v20 }
  0xf0   :  { %v864_v49 = vpack.c.bf16 %v805_v46, %v804_v47  ;;  %vm679_vm12 = vcmp.ge.f32.partialorder %v2939_v48, 0.0  ;;  %v743_v50 = vmul.f32 0.2, %v2939_v48  ;;  %v399_v51 = vpop.f32.mrb[11].mxu0  ;;  %3032 = vmatprep.subr.bf16.mxu0 %v3279_v44  ;;  %v3295_v47 = vld [vmem:[%s4095_s2 + $0xb8] sm:$0xff]  }
  0xf1   :  { %vm678_vm13 = vcmp.ge.f32.partialorder %v399_v51, 0.0  ;;  %v742_v53 = vmul.f32 0.2, %v399_v51 }
  0xf2   :  { %v3697_v54 = vsel %vm679_vm12, %v2939_v48, %v743_v50 }
  0xf3   :  { %v3699_v55 = vsel %vm678_vm13, %v399_v51, %v742_v53  ;;  %3033 = vmatpush3.bf16.msra.mxu0 %v3279_v44  ;;  %v2942_v56 = vpop.f32.mrb[12].mxu0  ;;  %v3294_v44 = vld [vmem:[%s4095_s2 + $0x68] sm:$0xff]  }
  0xf4   :  { %v865_v57 = vpack.c.bf16 %v3697_v54, %v3699_v55  ;;  %vm681_vm14 = vcmp.ge.f32.partialorder %v2942_v56, 0.0  ;;  %v745_v58 = vmul.f32 0.2, %v2942_v56  ;;  %v409_v59 = vpop.f32.mrb[13].mxu0  ;;  %3034 = vmatprep.subr.bf16.mxu0 %v3280_v52 }
  0xf5   :  { %vm680_vm15 = vcmp.ge.f32.partialorder %v409_v59, 0.0  ;;  %v744_v61 = vmul.f32 0.2, %v409_v59 }
  0xf6   :  { %v3706_v62 = vsel %vm681_vm14, %v2942_v56, %v745_v58  ;;  %v3297_v56 = vld [vmem:[%s4095_s2 + $0xc0] sm:$0xff]  }
  0xf7   :  { %v3708_v63 = vsel %vm680_vm15, %v409_v59, %v744_v61  ;;  %3035 = vmatpush3.bf16.msra.mxu0 %v3280_v52  ;;  %v2945_v0 = vpop.f32.mrb[14].mxu0  ;;  %v3296_v52 = vld [vmem:[%s4095_s2 + $0x70] sm:$0xff]   ;;  %v3298_v61 = vld [vmem:[%s4095_s2 + $0x78] sm:$0xff]  }
  0xf8   :  { %v866_v1 = vpack.c.bf16 %v3706_v62, %v3708_v63  ;;  %vm683_vm0 = vcmp.ge.f32.partialorder %v2945_v0, 0.0  ;;  %v747_v2 = vmul.f32 0.2, %v2945_v0  ;;  %v419_v3 = vpop.f32.mrb[15].mxu0  ;;  %3036 = vmatprep.subr.bf16.mxu0 %v3282_v60 }
  0xf9   :  { %vm682_vm1 = vcmp.ge.f32.partialorder %v419_v3, 0.0  ;;  %v746_v5 = vmul.f32 0.2, %v419_v3 }
  0xfa   :  { %v3715_v6 = vsel %vm683_vm0, %v2945_v0, %v747_v2 }
  0xfb   :  { %v3717_v7 = vsel %vm682_vm1, %v419_v3, %v746_v5  ;;  %3037 = vmatpush3.bf16.msra.mxu0 %v3282_v60  ;;  %v2948_v8 = vpop.f32.mrb[16].mxu0 }
  0xfc   :  { %v867_v9 = vpack.c.bf16 %v3715_v6, %v3717_v7  ;;  %vm685_vm2 = vcmp.ge.f32.partialorder %v2948_v8, 0.0  ;;  %v749_v10 = vmul.f32 0.2, %v2948_v8  ;;  %v429_v11 = vpop.f32.mrb[17].mxu0  ;;  %3042 = vmatprep.subr.bf16.mxu0 %v3284_v4 }
  0xfd   :  { %vm684_vm3 = vcmp.ge.f32.partialorder %v429_v11, 0.0  ;;  %v748_v14 = vmul.f32 0.2, %v429_v11 }
  0xfe   :  { %3039 = vmatmul.mubr.msk.bf16.vlgmr.msra.gmra.mrb[64].mxu0 %vm933_vm7, %v861_v27  ;;  %v813_v15 = vsel %vm685_vm2, %v2948_v8, %v749_v10 }
  0xff   :  { %3043 = vmatpush3.bf16.msra.mxu0 %v3284_v4  ;;  %3050 = vmatprep.mubr.msk.bf16.mxu0 %vm933_vm7, %v864_v49  ;;  %v2951_v16 = vpop.f32.mrb[18].mxu0  ;;  %v812_v17 = vsel %vm684_vm3, %v429_v11, %v748_v14 }
 0x100   :  { %vm687_vm4 = vcmp.ge.f32.partialorder %v2951_v16, 0.0  ;;  %v751_v18 = vmul.f32 0.2, %v2951_v16  ;;  %v439_v19 = vpop.f32.mrb[19].mxu0  ;;  %3044 = vmatprep.subr.bf16.mxu0 %v3286_v13  ;;  %v868_v20 = vpack.c.bf16 %v813_v15, %v812_v17 }
 0x101   :  { %vm686_vm5 = vcmp.ge.f32.partialorder %v439_v19, 0.0  ;;  %v750_v22 = vmul.f32 0.2, %v439_v19 }
 0x102   :  { %v815_v23 = vsel %vm687_vm4, %v2951_v16, %v751_v18  ;;  %3074 = vmatprep.mubr.msk.bf16.mxu1 %vm933_vm7, %v868_v20 }
 0x103   :  { %v814_v24 = vsel %vm686_vm5, %v439_v19, %v750_v22  ;;  %3045 = vmatpush3.bf16.msra.mxu0 %v3286_v13  ;;  %v2954_v25 = vpop.f32.mrb[20].mxu0  ;;  %v3300_v13 = vld [vmem:[%s4095_s2 + $0xd0] sm:$0xff]  }
 0x104   :  { %v869_v26 = vpack.c.bf16 %v815_v23, %v814_v24  ;;  %3046 = vmatprep.subr.bf16.mxu0 %v3288_v21  ;;  %vm689_vm6 = vcmp.ge.f32.partialorder %v2954_v25, 0.0  ;;  %v753_v27 = vmul.f32 0.2, %v2954_v25  ;;  %v449_v28 = vpop.f32.mrb[21].mxu0 }
 0x105   :  { %vm688_vm8 = vcmp.ge.f32.partialorder %v449_v28, 0.0  ;;  %v752_v31 = vmul.f32 0.2, %v449_v28 }
 0x106   :  { %3075 = vmatmul.mubr.msk.bf16.vlgmr.msra.gmra.mrb[0].mxu1 %vm933_vm7, %v869_v26  ;;  %v817_v32 = vsel %vm689_vm6, %v2954_v25, %v753_v27 }
 0x107   :  { %3047 = vmatpush3.bf16.msra.mxu0 %v3288_v21  ;;  %3079 = vmatpush3.bf16.msra.mxu1 %v3678_v12  ;;  %v816_v33 = vsel %vm688_vm8, %v449_v28, %v752_v31  ;;  %v2957_v34 = vpop.f32.mrb[22].mxu0  ;;  %v3301_v21 = vld [vmem:[%s4095_s2 + $0xd8] sm:$0xff]  }
 0x108   :  { %v870_v35 = vpack.c.bf16 %v817_v32, %v816_v33  ;;  %3048 = vmatprep.subr.bf16.mxu0 %v3290_v29  ;;  %3080 = vmatprep.subr.bf16.mxu1 %v3291_v30  ;;  %vm691_vm9 = vcmp.ge.f32.partialorder %v2957_v34, 0.0  ;;  %v755_v36 = vmul.f32 0.2, %v2957_v34  ;;  %v459_v37 = vpop.f32.mrb[23].mxu0 }
 0x109   :  { %vm690_vm10 = vcmp.ge.f32.partialorder %v459_v37, 0.0  ;;  %v754_v40 = vmul.f32 0.2, %v459_v37 }
 0x10a   :  { %v819_v41 = vsel %vm691_vm9, %v2957_v34, %v755_v36  ;;  %3086 = vmatprep.mubr.msk.bf16.mxu1 %vm933_vm7, %v870_v35  ;;  %v3303_v34 = vld [vmem:[%s4095_s2 + $0xe8] sm:$0xff]  }
 0x10b   :  { %3049 = vmatpush3.bf16.msra.mxu0 %v3290_v29  ;;  %3081 = vmatpush3.bf16.msra.mxu1 %v3291_v30  ;;  %v818_v12 = vsel %vm690_vm10, %v459_v37, %v754_v40  ;;  %v2960_v42 = vpop.f32.mrb[24].mxu0  ;;  %v3302_v29 = vld [vmem:[%s4095_s2 + $0xe0] sm:$0xff]  }
 0x10c   :  { %v871_v43 = vpack.c.bf16 %v819_v41, %v818_v12  ;;  %3054 = vmatprep.subr.bf16.mxu0 %v3292_v38  ;;  %3082 = vmatprep.subr.bf16.mxu1 %v3293_v39  ;;  %vm693_vm11 = vcmp.ge.f32.partialorder %v2960_v42, 0.0  ;;  %v757_v45 = vmul.f32 0.2, %v2960_v42  ;;  %v469_v46 = vpop.f32.mrb[25].mxu0  ;;  %v3304_v12 = vld [vmem:[%s4095_s2 + $0xf0] sm:$0xff]  }
 0x10d   :  { %vm692_vm12 = vcmp.ge.f32.partialorder %v469_v46, 0.0  ;;  %v756_v48 = vmul.f32 0.2, %v469_v46 }
 0x10e   :  { %3051 = vmatmul.mubr.msk.bf16.vlgmr.msra.gmra.mrb[64].mxu0 %vm933_vm7, %v865_v57  ;;  %v821_v49 = vsel %vm693_vm11, %v2960_v42, %v757_v45 }
 0x10f   :  { %3055 = vmatpush3.bf16.msra.mxu0 %v3292_v38  ;;  %3062 = vmatprep.mubr.msk.bf16.mxu0 %vm933_vm7, %v866_v1  ;;  %v820_v50 = vsel %vm692_vm12, %v469_v46, %v756_v48  ;;  %v2963_v51 = vpop.f32.mrb[26].mxu0  ;;  %v3299_v1 = vld [vmem:[%s4095_s2 + $0xc8] sm:$0xff]  }
 0x110   :  { %3083 = vmatpush3.bf16.msra.mxu1 %v3293_v39  ;;  %3056 = vmatprep.subr.bf16.mxu0 %v3294_v44  ;;  %v872_v53 = vpack.c.bf16 %v821_v49, %v820_v50  ;;  %vm695_vm13 = vcmp.ge.f32.partialorder %v2963_v51, 0.0  ;;  %v759_v54 = vmul.f32 0.2, %v2963_v51  ;;  %v479_v55 = vpop.f32.mrb[27].mxu0  ;;  %v3305_v49 = vld [vmem:[%s4095_s2 + $0xf8] sm:$0xff]  }
 0x111   :  { %3084 = vmatprep.subr.bf16.mxu1 %v3295_v47  ;;  %vm694_vm14 = vcmp.ge.f32.partialorder %v479_v55, 0.0  ;;  %v758_v57 = vmul.f32 0.2, %v479_v55 }
 0x112   :  { %v3768_v58 = vsel %vm695_vm13, %v2963_v51, %v759_v54 }
 0x113   :  { %3057 = vmatpush3.bf16.msra.mxu0 %v3294_v44  ;;  %v3770_v59 = vsel %vm694_vm14, %v479_v55, %v758_v57  ;;  %v2966_v60 = vpop.f32.mrb[28].mxu0  ;;  %v3306_v57 = vld [vmem:[%s4095_s2 + $0x100] sm:$0xff]  }
 0x114   :  { %3085 = vmatpush3.bf16.msra.mxu1 %v3295_v47  ;;  %3058 = vmatprep.subr.bf16.mxu0 %v3296_v52  ;;  %v873_v62 = vpack.c.bf16 %v3768_v58, %v3770_v59  ;;  %vm697_vm15 = vcmp.ge.f32.partialorder %v2966_v60, 0.0  ;;  %v761_v63 = vmul.f32 0.2, %v2966_v60  ;;  %v489_v0 = vpop.f32.mrb[29].mxu0 }
 0x115   :  { %3090 = vmatprep.subr.bf16.mxu1 %v3297_v56  ;;  %vm696_vm0 = vcmp.ge.f32.partialorder %v489_v0, 0.0  ;;  %v760_v2 = vmul.f32 0.2, %v489_v0 }
 0x116   :  { %v825_v3 = vsel %vm697_vm15, %v2966_v60, %v761_v63 }
 0x117   :  { %3087 = vmatmul.mubr.msk.bf16.vlgmr.msra.gmra.mrb[0].mxu1 %vm933_vm7, %v871_v43  ;;  %3059 = vmatpush3.bf16.msra.mxu0 %v3296_v52  ;;  %v824_v4 = vsel %vm696_vm0, %v489_v0, %v760_v2  ;;  %v2969_v5 = vpop.f32.mrb[30].mxu0 }
 0x118   :  { %3091 = vmatpush3.bf16.msra.mxu1 %v3297_v56  ;;  %3060 = vmatprep.subr.bf16.mxu0 %v3298_v61  ;;  %v874_v8 = vpack.c.bf16 %v825_v3, %v824_v4  ;;  %vm699_vm1 = vcmp.ge.f32.partialorder %v2969_v5, 0.0  ;;  %v763_v10 = vmul.f32 0.2, %v2969_v5  ;;  %v499_v11 = vpop.f32.mrb[31].mxu0 }
 0x119   :  { %3092 = vmatprep.subr.bf16.mxu1 %v3299_v1  ;;  %3098 = vmatprep.mubr.msk.bf16.mxu1 %vm933_vm7, %v872_v53  ;;  %vm698_vm2 = vcmp.ge.f32.partialorder %v499_v11, 0.0  ;;  %v762_v14 = vmul.f32 0.2, %v499_v11 }
 0x11a   :  { %v3785_v15 = vsel %vm699_vm1, %v2969_v5, %v763_v10 }
 0x11b   :  { %3061 = vmatpush3.bf16.msra.mxu0 %v3298_v61  ;;  %v3787_v16 = vsel %vm698_vm2, %v499_v11, %v762_v14  ;;  %v2972_v17 = vpop.f32.mrb[32].mxu0 }
 0x11c   :  { %3093 = vmatpush3.bf16.msra.mxu1 %v3299_v1  ;;  %v875_v18 = vpack.c.bf16 %v3785_v15, %v3787_v16  ;;  %vm701_vm3 = vcmp.ge.f32.partialorder %v2972_v17, 0.0  ;;  %v765_v19 = vmul.f32 0.2, %v2972_v17  ;;  %v509_v20 = vpop.f32.mrb[33].mxu0  ;;  %v3307_v1 = vld [vmem:[%s4095_s2 + $0x108] sm:$0xff]  }
 0x11d   :  { %3094 = vmatprep.subr.bf16.mxu1 %v3300_v13  ;;  %vm700_vm4 = vcmp.ge.f32.partialorder %v509_v20, 0.0  ;;  %v764_v22 = vmul.f32 0.2, %v509_v20 }
 0x11e   :  { %3063 = vmatmul.mubr.msk.bf16.vlgmr.msra.gmra.mrb[64].mxu0 %vm933_vm7, %v867_v9  ;;  %v3798_v23 = vsel %vm701_vm3, %v2972_v17, %v765_v19 }
 0x11f   :  { %v3800_v24 = vsel %vm700_vm4, %v509_v20, %v764_v22  ;;  %v2975_v25 = vpop.f32.mrb[34].mxu0 }
 0x120   :  { %3095 = vmatpush3.bf16.msra.mxu1 %v3300_v13  ;;  %v876_v26 = vpack.c.bf16 %v3798_v23, %v3800_v24  ;;  %vm703_vm5 = vcmp.ge.f32.partialorder %v2975_v25, 0.0  ;;  %v767_v27 = vmul.f32 0.2, %v2975_v25  ;;  %v519_v28 = vpop.f32.mrb[35].mxu0  ;;  %v3308_v13 = vld [vmem:[%s4095_s2 + $0x110] sm:$0xff]  }
 0x121   :  { %3096 = vmatprep.subr.bf16.mxu1 %v3301_v21  ;;  %vm702_vm6 = vcmp.ge.f32.partialorder %v519_v28, 0.0  ;;  %v766_v6 = vmul.f32 0.2, %v519_v28 }
 0x122   :  { %v3807_v7 = vsel %vm703_vm5, %v2975_v25, %v767_v27 }
 0x123   :  { %v3809_v9 = vsel %vm702_vm6, %v519_v28, %v766_v6  ;;  %v2978_v30 = vpop.f32.mrb[36].mxu0 }
 0x124   :  { %3097 = vmatpush3.bf16.msra.mxu1 %v3301_v21  ;;  %v877_v31 = vpack.c.bf16 %v3807_v7, %v3809_v9  ;;  %vm705_vm8 = vcmp.ge.f32.partialorder %v2978_v30, 0.0  ;;  %v769_v32 = vmul.f32 0.2, %v2978_v30  ;;  %v529_v33 = vpop.f32.mrb[37].mxu0  ;;  %v3309_v21 = vld [vmem:[%s4095_s2 + $0x118] sm:$0xff]   ;;  %v3312_v7 = vld [vmem:[%s4095_s2 + $0x130] sm:$0xff]  }
 0x125   :  { %3102 = vmatprep.subr.bf16.mxu1 %v3302_v29  ;;  %vm704_vm9 = vcmp.ge.f32.partialorder %v529_v33, 0.0  ;;  %v768_v35 = vmul.f32 0.2, %v529_v33 }
 0x126   :  { %v3816_v36 = vsel %vm705_vm8, %v2978_v30, %v769_v32 }
 0x127   :  { %3099 = vmatmul.mubr.msk.bf16.vlgmr.msra.gmra.mrb[0].mxu1 %vm933_vm7, %v873_v62  ;;  %v3822_v37 = vsel %vm704_vm9, %v529_v33, %v768_v35  ;;  %v2981_v38 = vpop.f32.mrb[38].mxu0 }
 0x128   :  { %3103 = vmatpush3.bf16.msra.mxu1 %v3302_v29  ;;  %3110 = vmatprep.mubr.msk.bf16.mxu1 %vm933_vm7, %v874_v8  ;;  %v878_v39 = vpack.c.bf16 %v3816_v36, %v3822_v37  ;;  %vm707_vm10 = vcmp.ge.f32.partialorder %v2981_v38, 0.0  ;;  %v771_v40 = vmul.f32 0.2, %v2981_v38  ;;  %v539_v41 = vpop.f32.mrb[39].mxu0  ;;  %v3310_v29 = vld [vmem:[%s4095_s2 + $0x120] sm:$0xff]  }
 0x129   :  { %3104 = vmatprep.subr.bf16.mxu1 %v3303_v34  ;;  %vm706_vm11 = vcmp.ge.f32.partialorder %v539_v41, 0.0  ;;  %v770_v42 = vmul.f32 0.2, %v539_v41 }
 0x12a   :  { %v3830_v43 = vsel %vm707_vm10, %v2981_v38, %v771_v40  ;;  %v3311_v40 = vld [vmem:[%s4095_s2 + $0x128] sm:$0xff]  }
 0x12b   :  { %v3832_v44 = vsel %vm706_vm11, %v539_v41, %v770_v42  ;;  %v2984_v45 = vpop.f32.mrb[40].mxu0 }
 0x12c   :  { %3105 = vmatpush3.bf16.msra.mxu1 %v3303_v34  ;;  %v879_v46 = vpack.c.bf16 %v3830_v43, %v3832_v44  ;;  %vm709_vm12 = vcmp.ge.f32.partialorder %v2984_v45, 0.0  ;;  %v773_v47 = vmul.f32 0.2, %v2984_v45  ;;  %v549_v48 = vpop.f32.mrb[41].mxu0  ;;  %v3316_v43 = vld [vmem:[%s4095_s2 + $0x150] sm:$0xff]  }
 0x12d   :  { %3106 = vmatprep.subr.bf16.mxu1 %v3304_v12  ;;  %vm708_vm13 = vcmp.ge.f32.partialorder %v549_v48, 0.0  ;;  %v772_v50 = vmul.f32 0.2, %v549_v48 }
 0x12e   :  { %v3839_v51 = vsel %vm709_vm12, %v2984_v45, %v773_v47 }
 0x12f   :  { %v3841_v52 = vsel %vm708_vm13, %v549_v48, %v772_v50  ;;  %v2987_v53 = vpop.f32.mrb[42].mxu0 }
 0x130   :  { %3107 = vmatpush3.bf16.msra.mxu1 %v3304_v12  ;;  %v880_v54 = vpack.c.bf16 %v3839_v51, %v3841_v52  ;;  %vm711_vm14 = vcmp.ge.f32.partialorder %v2987_v53, 0.0  ;;  %v775_v55 = vmul.f32 0.2, %v2987_v53  ;;  %v559_v56 = vpop.f32.mrb[43].mxu0  ;;  %v3317_v52 = vld [vmem:[%s4095_s2 + $0x158] sm:$0xff]  }
 0x131   :  { %3108 = vmatprep.subr.bf16.mxu1 %v3305_v49  ;;  %vm710_vm15 = vcmp.ge.f32.partialorder %v559_v56, 0.0  ;;  %v774_v58 = vmul.f32 0.2, %v559_v56 }
 0x132   :  { %v3848_v59 = vsel %vm711_vm14, %v2987_v53, %v775_v55  ;;  %v3313_v55 = vld [vmem:[%s4095_s2 + $0x138] sm:$0xff]  }
 0x133   :  { %v3850_v60 = vsel %vm710_vm15, %v559_v56, %v774_v58  ;;  %v2990_v61 = vpop.f32.mrb[44].mxu0 }
 0x134   :  { %3109 = vmatpush3.bf16.msra.mxu1 %v3305_v49  ;;  %v881_v62 = vpack.c.bf16 %v3848_v59, %v3850_v60  ;;  %vm713_vm0 = vcmp.ge.f32.partialorder %v2990_v61, 0.0  ;;  %v777_v63 = vmul.f32 0.2, %v2990_v61  ;;  %v569_v0 = vpop.f32.mrb[45].mxu0  ;;  %v3322_v59 = vld [vmem:[%s4095_s2 + $0x180] sm:$0xff]   ;;  %v3323_v60 = vld [vmem:[%s4095_s2 + $0x188] sm:$0xff]  }
 0x135   :  { %3114 = vmatprep.subr.bf16.mxu1 %v3306_v57  ;;  %vm712_vm1 = vcmp.ge.f32.partialorder %v569_v0, 0.0  ;;  %v776_v2 = vmul.f32 0.2, %v569_v0 }
 0x136   :  { %v3857_v3 = vsel %vm713_vm0, %v2990_v61, %v777_v63 }
 0x137   :  { %3111 = vmatmul.mubr.msk.bf16.vlgmr.msra.gmra.mrb[0].mxu1 %vm933_vm7, %v875_v18  ;;  %v3863_v4 = vsel %vm712_vm1, %v569_v0, %v776_v2  ;;  %v2993_v5 = vpop.f32.mrb[46].mxu0  ;;  %v3314_v2 = vld [vmem:[%s4095_s2 + $0x140] sm:$0xff]  }
 0x138   :  { %3115 = vmatpush3.bf16.msra.mxu1 %v3306_v57  ;;  %3122 = vmatprep.mubr.msk.bf16.mxu1 %vm933_vm7, %v876_v26  ;;  %v882_v8 = vpack.c.bf16 %v3857_v3, %v3863_v4  ;;  %vm715_vm2 = vcmp.ge.f32.partialorder %v2993_v5, 0.0  ;;  %v779_v10 = vmul.f32 0.2, %v2993_v5  ;;  %v579_v11 = vpop.f32.mrb[47].mxu0  ;;  %v3325_v3 = vld [vmem:[%s4095_s2 + $0x198] sm:$0xff]   ;;  %v3326_v4 = vld [vmem:[%s4095_s2 + $0x1a0] sm:$0xff]  }
 0x139   :  { %3116 = vmatprep.subr.bf16.mxu1 %v3307_v1  ;;  %vm714_vm3 = vcmp.ge.f32.partialorder %v579_v11, 0.0  ;;  %v778_v14 = vmul.f32 0.2, %v579_v11 }
 0x13a   :  { %v3874_v15 = vsel %vm715_vm2, %v2993_v5, %v779_v10 }
 0x13b   :  { %v3876_v16 = vsel %vm714_vm3, %v579_v11, %v778_v14  ;;  %v2996_v17 = vpop.f32.mrb[48].mxu0 }
 0x13c   :  { %3117 = vmatpush3.bf16.msra.mxu1 %v3307_v1  ;;  %v883_v18 = vpack.c.bf16 %v3874_v15, %v3876_v16  ;;  %vm717_vm4 = vcmp.ge.f32.partialorder %v2996_v17, 0.0  ;;  %v781_v19 = vmul.f32 0.2, %v2996_v17  ;;  %v589_v20 = vpop.f32.mrb[49].mxu0  ;;  %v3328_v15 = vld [vmem:[%s4095_s2 + $0x1b0] sm:$0xff]   ;;  %v3329_v16 = vld [vmem:[%s4095_s2 + $0x1b8] sm:$0xff]  }
 0x13d   :  { %3118 = vmatprep.subr.bf16.mxu1 %v3308_v13  ;;  %vm716_vm5 = vcmp.ge.f32.partialorder %v589_v20, 0.0  ;;  %v780_v22 = vmul.f32 0.2, %v589_v20 }
 0x13e   :  { %v3883_v23 = vsel %vm717_vm4, %v2996_v17, %v781_v19 }
 0x13f   :  { %v3885_v24 = vsel %vm716_vm5, %v589_v20, %v780_v22  ;;  %v2999_v25 = vpop.f32.mrb[50].mxu0  ;;  %v3315_v20 = vld [vmem:[%s4095_s2 + $0x148] sm:$0xff]  }
 0x140   :  { %3119 = vmatpush3.bf16.msra.mxu1 %v3308_v13  ;;  %v884_v26 = vpack.c.bf16 %v3883_v23, %v3885_v24  ;;  %vm719_vm6 = vcmp.ge.f32.partialorder %v2999_v25, 0.0  ;;  %v783_v27 = vmul.f32 0.2, %v2999_v25  ;;  %v599_v28 = vpop.f32.mrb[51].mxu0  ;;  %v3331_v23 = vld [vmem:[%s4095_s2 + $0x1c8] sm:$0xff]   ;;  %v3332_v24 = vld [vmem:[%s4095_s2 + $0x1d0] sm:$0xff]  }
 0x141   :  { %3120 = vmatprep.subr.bf16.mxu1 %v3309_v21  ;;  %vm718_vm8 = vcmp.ge.f32.partialorder %v599_v28, 0.0  ;;  %v782_v6 = vmul.f32 0.2, %v599_v28 }
 0x142   :  { %v3892_v30 = vsel %vm719_vm6, %v2999_v25, %v783_v27 }
 0x143   :  { %v3894_v32 = vsel %vm718_vm8, %v599_v28, %v782_v6  ;;  %v3002_v33 = vpop.f32.mrb[52].mxu0 }
 0x144   :  { %3121 = vmatpush3.bf16.msra.mxu1 %v3309_v21  ;;  %v885_v34 = vpack.c.bf16 %v3892_v30, %v3894_v32  ;;  %vm721_vm9 = vcmp.ge.f32.partialorder %v3002_v33, 0.0  ;;  %v785_v35 = vmul.f32 0.2, %v3002_v33  ;;  %v609_v38 = vpop.f32.mrb[53].mxu0  ;;  %v3334_v30 = vld [vmem:[%s4095_s2 + $0x1e0] sm:$0xff]   ;;  %v3335_v32 = vld [vmem:[%s4095_s2 + $0x1e8] sm:$0xff]  }
 0x145   :  { %3126 = vmatprep.subr.bf16.mxu1 %v3310_v29  ;;  %vm720_vm10 = vcmp.ge.f32.partialorder %v609_v38, 0.0  ;;  %v784_v41 = vmul.f32 0.2, %v609_v38 }
 0x146   :  { %v3901_v12 = vsel %vm721_vm9, %v3002_v33, %v785_v35  ;;  %v3319_v35 = vld [vmem:[%s4095_s2 + $0x168] sm:$0xff]   ;;  %vm2446_vm9 = vcmask 0  }
 0x147   :  { %3123 = vmatmul.mubr.msk.bf16.vlgmr.msra.gmra.mrb[0].mxu1 %vm933_vm7, %v877_v31  ;;  %v3907_v42 = vsel %vm720_vm10, %v609_v38, %v784_v41  ;;  %v3005_v45 = vpop.f32.mrb[54].mxu0  ;;  %v3320_v38 = vld [vmem:[%s4095_s2 + $0x170] sm:$0xff]   ;;  %v3337_v41 = vld [vmem:[%s4095_s2 + $0x1f8] sm:$0xff]  }
 0x148   :  { %3127 = vmatpush3.bf16.msra.mxu1 %v3310_v29  ;;  %3134 = vmatprep.mubr.msk.bf16.mxu1 %vm933_vm7, %v878_v39  ;;  %v886_v47 = vpack.c.bf16 %v3901_v12, %v3907_v42  ;;  %vm723_vm11 = vcmp.ge.f32.partialorder %v3005_v45, 0.0  ;;  %v787_v48 = vmul.f32 0.2, %v3005_v45  ;;  %v619_v49 = vpop.f32.mrb[55].mxu0 }
 0x149   :  { %3128 = vmatprep.subr.bf16.mxu1 %v3311_v40  ;;  %vm722_vm12 = vcmp.ge.f32.partialorder %v619_v49, 0.0  ;;  %v786_v9 = vmul.f32 0.2, %v619_v49 }
 0x14a   :  { %v3918_v31 = vsel %vm723_vm11, %v3005_v45, %v787_v48 }
 0x14b   :  { %v3920_v50 = vsel %vm722_vm12, %v619_v49, %v786_v9  ;;  %v3008_v36 = vpop.f32.mrb[56].mxu0 }
 0x14c   :  { %3129 = vmatpush3.bf16.msra.mxu1 %v3311_v40  ;;  %v887_v37 = vpack.c.bf16 %v3918_v31, %v3920_v50  ;;  %vm725_vm13 = vcmp.ge.f32.partialorder %v3008_v36, 0.0  ;;  %v789_v39 = vmul.f32 0.2, %v3008_v36  ;;  %v629_v53 = vpop.f32.mrb[57].mxu0  ;;  %v3321_v40 = vld [vmem:[%s4095_s2 + $0x178] sm:$0xff]  }
 0x14d   :  { %3130 = vmatprep.subr.bf16.mxu1 %v3312_v7  ;;  %vm724_vm14 = vcmp.ge.f32.partialorder %v629_v53, 0.0  ;;  %v788_v56 = vmul.f32 0.2, %v629_v53 }
 0x14e   :  { %v3927_v57 = vsel %vm725_vm13, %v3008_v36, %v789_v39 }
 0x14f   :  { %v3929_v58 = vsel %vm724_vm14, %v629_v53, %v788_v56  ;;  %v3011_v61 = vpop.f32.mrb[58].mxu0 }
 0x150   :  { %3131 = vmatpush3.bf16.msra.mxu1 %v3312_v7  ;;  %v888_v63 = vpack.c.bf16 %v3927_v57, %v3929_v58  ;;  %vm727_vm15 = vcmp.ge.f32.partialorder %v3011_v61, 0.0  ;;  %v791_v0 = vmul.f32 0.2, %v3011_v61  ;;  %v639_v1 = vpop.f32.mrb[59].mxu0 }
 0x151   :  { %3132 = vmatprep.subr.bf16.mxu1 %v3313_v55  ;;  %vm726_vm0 = vcmp.ge.f32.partialorder %v639_v1, 0.0  ;;  %v790_v5 = vmul.f32 0.2, %v639_v1 }
 0x152   :  { %v3936_v10 = vsel %vm727_vm15, %v3011_v61, %v791_v0 }
 0x153   :  { %v3938_v11 = vsel %vm726_vm0, %v639_v1, %v790_v5  ;;  %v3014_v13 = vpop.f32.mrb[60].mxu0 }
 0x154   :  { %3133 = vmatpush3.bf16.msra.mxu1 %v3313_v55  ;;  %v889_v14 = vpack.c.bf16 %v3936_v10, %v3938_v11  ;;  %vm729_vm1 = vcmp.ge.f32.partialorder %v3014_v13, 0.0  ;;  %v793_v17 = vmul.f32 0.2, %v3014_v13  ;;  %v649_v19 = vpop.f32.mrb[61].mxu0 }
 0x155   :  { %3138 = vmatprep.subr.bf16.mxu1 %v3314_v2  ;;  %vm728_vm2 = vcmp.ge.f32.partialorder %v649_v19, 0.0  ;;  %v792_v21 = vmul.f32 0.2, %v649_v19 }
 0x156   :  { %v3945_v22 = vsel %vm729_vm1, %v3014_v13, %v793_v17 }
 0x157   :  { %3135 = vmatmul.mubr.msk.bf16.vlgmr.msra.gmra.mrb[0].mxu1 %vm933_vm7, %v879_v46  ;;  %v3951_v25 = vsel %vm728_vm2, %v649_v19, %v792_v21  ;;  %v3017_v27 = vpop.f32.mrb[62].mxu0 }
 0x158   :  { %3139 = vmatpush3.bf16.msra.mxu1 %v3314_v2  ;;  %3146 = vmatprep.mubr.msk.bf16.mxu1 %vm933_vm7, %v880_v54  ;;  %v890_v28 = vpack.c.bf16 %v3945_v22, %v3951_v25  ;;  %vm731_vm3 = vcmp.ge.f32.partialorder %v3017_v27, 0.0  ;;  %v795_v29 = vmul.f32 0.2, %v3017_v27  ;;  %v659_v6 = vpop.f32.mrb[63].mxu0  ;;  %v3318_v54 = vld [vmem:[%s4095_s2 + $0x160] sm:$0xff]  }
 0x159   :  { %3140 = vmatprep.subr.bf16.mxu1 %v3315_v20  ;;  %vm730_vm4 = vcmp.ge.f32.partialorder %v659_v6, 0.0  ;;  %v794_v44 = vmul.f32 0.2, %v659_v6 }
 0x15a   :  { %v3962_v46 = vsel %vm731_vm3, %v3017_v27, %v795_v29 }
 0x15b   :  { %v3964_v33 = vsel %vm730_vm4, %v659_v6, %v794_v44 }
 0x15c   :  { %3141 = vmatpush3.bf16.msra.mxu1 %v3315_v20  ;;  %v891_v51 = vpack.c.bf16 %v3962_v46, %v3964_v33 }
 0x15d   :  { %3142 = vmatprep.subr.bf16.mxu1 %v3316_v43 }
 0x160   :  { %3143 = vmatpush3.bf16.msra.mxu1 %v3316_v43 }
 0x161   :  { %3144 = vmatprep.subr.bf16.mxu1 %v3317_v52 }
 0x164   :  { %3145 = vmatpush3.bf16.msra.mxu1 %v3317_v52 }
 0x165   :  { %3150 = vmatprep.subr.bf16.mxu1 %v3318_v54 }
 0x167   :  { %3147 = vmatmul.mubr.msk.bf16.vlgmr.msra.gmra.mrb[0].mxu1 %vm933_vm7, %v881_v62  ;;  %v3324_v62 = vld [vmem:[%s4095_s2 + $0x190] sm:$0xff]  }
 0x168   :  { %3151 = vmatpush3.bf16.msra.mxu1 %v3318_v54  ;;  %3158 = vmatprep.mubr.msk.bf16.mxu1 %vm933_vm7, %v882_v8  ;;  %v3327_v8 = vld [vmem:[%s4095_s2 + $0x1a8] sm:$0xff]  }
 0x169   :  { %3152 = vmatprep.subr.bf16.mxu1 %v3319_v35 }
 0x16c   :  { %3153 = vmatpush3.bf16.msra.mxu1 %v3319_v35 }
 0x16d   :  { %3154 = vmatprep.subr.bf16.mxu1 %v3320_v38 }
 0x170   :  { %3155 = vmatpush3.bf16.msra.mxu1 %v3320_v38 }
 0x171   :  { %3156 = vmatprep.subr.bf16.mxu1 %v3321_v40 }
 0x174   :  { %3157 = vmatpush3.bf16.msra.mxu1 %v3321_v40  ;;  %v2753_v40 = vld [vmem:[%s4097_s4] ss:$0 sm:$0xff] }
 0x175   :  { %3162 = vmatprep.subr.bf16.mxu1 %v3322_v59 }
 0x177   :  { %3159 = vmatmul.mubr.msk.bf16.vlgmr.msra.gmra.mrb[0].mxu1 %vm933_vm7, %v883_v18  ;;  %v3330_v18 = vld [vmem:[%s4095_s2 + $0x1c0] sm:$0xff]  }
 0x178   :  { %3163 = vmatpush3.bf16.msra.mxu1 %v3322_v59  ;;  %3170 = vmatprep.mubr.msk.bf16.mxu1 %vm933_vm7, %v884_v26  ;;  %v3333_v26 = vld [vmem:[%s4095_s2 + $0x1d8] sm:$0xff]  }
 0x179   :  { %3164 = vmatprep.subr.bf16.mxu1 %v3323_v60 }
 0x17c   :  { %3165 = vmatpush3.bf16.msra.mxu1 %v3323_v60 }
 0x17d   :  { %3166 = vmatprep.subr.bf16.mxu1 %v3324_v62 }
 0x180   :  { %3167 = vmatpush3.bf16.msra.mxu1 %v3324_v62 }
 0x181   :  { %3168 = vmatprep.subr.bf16.mxu1 %v3325_v3 }
 0x184   :  { %3169 = vmatpush3.bf16.msra.mxu1 %v3325_v3 }
 0x185   :  { %3174 = vmatprep.subr.bf16.mxu1 %v3326_v4 }
 0x187   :  { %3171 = vmatmul.mubr.msk.bf16.vlgmr.msra.gmra.mrb[0].mxu1 %vm933_vm7, %v885_v34  ;;  %v3336_v34 = vld [vmem:[%s4095_s2 + $0x1f0] sm:$0xff]  }
 0x188   :  { %3175 = vmatpush3.bf16.msra.mxu1 %v3326_v4  ;;  %3182 = vmatprep.mubr.msk.bf16.mxu1 %vm933_vm7, %v886_v47 }
 0x189   :  { %3176 = vmatprep.subr.bf16.mxu1 %v3327_v8 }
 0x18c   :  { %3177 = vmatpush3.bf16.msra.mxu1 %v3327_v8 }
 0x18d   :  { %3178 = vmatprep.subr.bf16.mxu1 %v3328_v15 }
 0x190   :  { %3179 = vmatpush3.bf16.msra.mxu1 %v3328_v15 }
 0x191   :  { %3180 = vmatprep.subr.bf16.mxu1 %v3329_v16 }
 0x194   :  { %3181 = vmatpush3.bf16.msra.mxu1 %v3329_v16 }
 0x195   :  { %3186 = vmatprep.subr.bf16.mxu1 %v3330_v18 }
 0x197   :  { %3183 = vmatmul.mubr.msk.bf16.vlgmr.msra.gmra.mrb[0].mxu1 %vm933_vm7, %v887_v37 }
 0x198   :  { %3187 = vmatpush3.bf16.msra.mxu1 %v3330_v18  ;;  %3194 = vmatprep.mubr.msk.bf16.mxu1 %vm933_vm7, %v888_v63  ;;  %v2425_v18 = vld [vmem:[%s4098_s5] sm:$0xff] }
 0x199   :  { %3188 = vmatprep.subr.bf16.mxu1 %v3331_v23 }
 0x19c   :  { %3189 = vmatpush3.bf16.msra.mxu1 %v3331_v23 }
 0x19d   :  { %3190 = vmatprep.subr.bf16.mxu1 %v3332_v24 }
 0x1a0   :  { %3191 = vmatpush3.bf16.msra.mxu1 %v3332_v24 }
 0x1a1   :  { %3192 = vmatprep.subr.bf16.mxu1 %v3333_v26 }
 0x1a4   :  { %3193 = vmatpush3.bf16.msra.mxu1 %v3333_v26 }
 0x1a5   :  { %3198 = vmatprep.subr.bf16.mxu1 %v3334_v30 }
 0x1a7   :  { %3195 = vmatmul.mubr.msk.bf16.vlgmr.msra.gmra.mrb[0].mxu1 %vm933_vm7, %v889_v14 }
 0x1a8   :  { %3199 = vmatpush3.bf16.msra.mxu1 %v3334_v30  ;;  %3206 = vmatprep.mubr.msk.bf16.mxu1 %vm933_vm7, %v890_v28 }
 0x1a9   :  { %3200 = vmatprep.subr.bf16.mxu1 %v3335_v32 }
 0x1ac   :  { %3201 = vmatpush3.bf16.msra.mxu1 %v3335_v32 }
 0x1ad   :  { %3202 = vmatprep.subr.bf16.mxu1 %v3336_v34 }
 0x1b0   :  { %3203 = vmatpush3.bf16.msra.mxu1 %v3336_v34 }
 0x1b1   :  { %3204 = vmatprep.subr.bf16.mxu1 %v3337_v41 }
 0x1b4   :  { %3205 = vmatpush3.bf16.msra.mxu1 %v3337_v41 }
 0x1b7   :  { %3207 = vmatmul.mubr.msk.bf16.vlgmr.msra.gmra.mrb[0].mxu1 %vm933_vm7, %v891_v51  ;;  %v2752_v51 = vld [vmem:[%s4096_s3] ss:$0 sm:$0xff] }
 0x1f1   :  { %v3064_v12 = vpop.f32.mrb[64].mxu0 }
 0x1f2   :  { %v1233_v42 = vpop.f32.mrb[65].mxu0 }
 0x1f3   :  { %v3065_v45 = vpop.f32.mrb[66].mxu0 }
 0x1f4   :  { %v1236_v47 = vpop.f32.mrb[67].mxu0 }
 0x28a   :  { %v3208_v48 = vpop.f32.mrb[0].mxu1 }
 0x28b   :  { %v3214_v49 = vadd.f32 %v3208_v48, %v3064_v12  ;;  %v2337_v7 = vpop.f32.mrb[1].mxu1 }
 0x28c   :  { %v3215_v9 = vadd.f32 %v2337_v7, %v1233_v42  ;;  %v3209_v31 = vpop.f32.mrb[2].mxu1 }
 0x28d   :  { %v3216_v50 = vadd.f32 %v3209_v31, %v3065_v45  ;;  %v2340_v36 = vpop.f32.mrb[3].mxu1  ;;  %v2426_v45 = vld [vmem:[%s4098_s5 + $0x8] sm:$0xff] }
 0x28e   :  { %v3217_v37 = vadd.f32 %v2340_v36, %v1236_v47 }
 0x290   :  { %v2356_v39 = vadd.f32 %v3217_v37, %v3215_v9 }
 0x292   :  { %v2357_v53 = vadd.f32 %v3214_v49, %v2356_v39 }
 0x294   :  { %v2358_v55 = vadd.f32 %v3216_v50, %v2357_v53 }
 0x296   :  { %v2359_v56 = vrot.slane %v2358_v55, 4 }
 0x298   :  { %v2360_v57 = vadd.f32 %v2359_v56, %v2358_v55 }
 0x29a   :  { %v2361_v58 = vrot.slane %v2360_v57, 2 }
 0x29c   :  { %v2362_v61 = vadd.f32 %v2361_v58, %v2360_v57 }
 0x29e   :  { %v2363_v63 = vrot.slane %v2362_v61, 1 }
 0x2a0   :  { %v2364_v0 = vadd.f32 %v2363_v63, %v2362_v61 }
 0x2a2   :  { %v2366_v1 = vmul.f32 0.03125, %v2364_v0 }
 0x2a4   :  { %v2367_v2 = vsub.f32 %v3215_v9, %v2366_v1  ;;  %v2368_v5 = vsub.f32 %v3217_v37, %v2366_v1  ;;  %v2369_v10 = vsub.f32 %v3214_v49, %v2366_v1  ;;  %v2370_v11 = vsub.f32 %v3216_v50, %v2366_v1 }
 0x2a6   :  { %v2371_v13 = vmul.f32 %v2367_v2, %v2367_v2  ;;  %v2372_v14 = vmul.f32 %v2368_v5, %v2368_v5  ;;  %v2373_v17 = vmul.f32 %v2369_v10, %v2369_v10  ;;  %v2374_v20 = vmul.f32 %v2370_v11, %v2370_v11 }
 0x2a8   :  { %v2375_v19 = vadd.f32 %v2372_v14, %v2371_v13 }
 0x2aa   :  { %v2376_v21 = vadd.f32 %v2375_v19, %v2373_v17 }
 0x2ac   :  { %v2377_v22 = vadd.f32 %v2376_v21, %v2374_v20 }
 0x2ae   :  { %v2378_v25 = vrot.slane %v2377_v22, 4 }
 0x2b0   :  { %v2379_v27 = vadd.f32 %v2378_v25, %v2377_v22 }
 0x2b2   :  { %v2380_v28 = vrot.slane %v2379_v27, 2 }
 0x2b4   :  { %v2381_v29 = vadd.f32 %v2380_v28, %v2379_v27 }
 0x2b6   :  { %v2382_v6 = vrot.slane %v2381_v29, 1 }
 0x2b8   :  { %v2383_v43 = vadd.f32 %v2382_v6, %v2381_v29 }
 0x2ba   :  { %v2384_v44 = vmul.f32 0.03125, %v2383_v43 }
 0x2bc   :  { %v2385_v46 = vadd.f32 1e-05, %v2384_v44 }
 0x2be   :  { %3338 = vrsqrt.f32 %v2385_v46 }
 0x2c8   :  { %v3339_v33 = vpop.eup %3338 }
 0x2c9   :  { %v2388_v52 = vmul.f32 %v3339_v33, %v2368_v5  ;;  %v2389_v54 = vmul.f32 %v3339_v33, %v2369_v10  ;;  %v2387_v35 = vmul.f32 %v3339_v33, %v2367_v2  ;;  %v2390_v38 = vmul.f32 %v3339_v33, %v2370_v11 }
 0x2cb   :  { %v2399_v59 = vmul.f32 %v2752_v51, %v2388_v52  ;;  %v2400_v60 = vmul.f32 %v2752_v51, %v2389_v54  ;;  %v2398_v62 = vmul.f32 %v2752_v51, %v2387_v35  ;;  %v2401_v3 = vmul.f32 %v2752_v51, %v2390_v38 }
 0x2cd   :  { %v2411_v4 = vadd.f32 %v2753_v40, %v2400_v60  ;;  %v2409_v8 = vadd.f32 %v2753_v40, %v2398_v62  ;;  %v2412_v15 = vadd.f32 %v2753_v40, %v2401_v3  ;;  %v2410_v16 = vadd.f32 %v2753_v40, %v2399_v59 }
 0x2cf   :  { %vm2415_vm7 = vcmp.ge.f32.partialorder %v2411_v4, 0.0  ;;  %v2419_v23 = vmul.f32 0.2, %v2411_v4  ;;  %vm2413_vm5 = vcmp.ge.f32.partialorder %v2409_v8, 0.0  ;;  %v2417_v24 = vmul.f32 0.2, %v2409_v8 }
 0x2d0   :  { %vm2416_vm6 = vcmp.ge.f32.partialorder %v2412_v15, 0.0  ;;  %v2420_v26 = vmul.f32 0.2, %v2412_v15  ;;  %vm2414_vm8 = vcmp.ge.f32.partialorder %v2410_v16, 0.0  ;;  %v2418_v30 = vmul.f32 0.2, %v2410_v16 }
 0x2d1   :  { %v2423_v32 = vsel %vm2415_vm7, %v2411_v4, %v2419_v23  ;;  %v2421_v34 = vsel %vm2413_vm5, %v2409_v8, %v2417_v24 }
 0x2d2   :  { %v2448_v41 = vmul.f32 %v2425_v18, %v2423_v32  ;;  %v2427_v12 = vmul.f32 %v2425_v18, %v2421_v34  ;;  %v2424_v42 = vsel %vm2416_vm6, %v2412_v15, %v2420_v26  ;;  %v2422_v47 = vsel %vm2414_vm8, %v2410_v16, %v2418_v30 }
 0x2d3   :  { %v2449_v48 = vmul.f32 %v2426_v45, %v2424_v42  ;;  %v2428_v49 = vmul.f32 %v2426_v45, %v2422_v47 }
 0x2d4   :  { %2450 = vadd.xlane.f32.xlu1 %v2448_v41  ;;  %2429 = vadd.xlane.f32.xlu0 %v2427_v12 }
 0x2d8   :  { %2452 = vadd.xlane.f32.xlu1 %v2449_v48  ;;  %2431 = vadd.xlane.f32.xlu0 %v2428_v49 }
 0x361   :  { %v2451_v7 = vpop.xlane.xlu1 %2450  ;;  %v2430_v9 = vpop.xlane.xlu0 %2429 }
 0x365   :  { %v2453_v31 = vpop.xlane.xlu1 %2452  ;;  %v2432_v50 = vpop.xlane.xlu0 %2431 }
 0x366   :  { %v2454_v36 = vadd.f32 %v2453_v31, %v2451_v7  ;;  %v2433_v37 = vadd.f32 %v2432_v50, %v2430_v9 }
 0x368   :  { %v2455_v39 = vrot.slane %v2454_v36, 4  ;;  %v2434_v53 = vrot.slane %v2433_v37, 4 }
 0x36a   :  { %v2456_v55 = vadd.f32 %v2455_v39, %v2454_v36  ;;  %v2435_v56 = vadd.f32 %v2434_v53, %v2433_v37 }
 0x36c   :  { %v2457_v57 = vrot.slane %v2456_v55, 2  ;;  %v2436_v58 = vrot.slane %v2435_v56, 2 }
 0x36e   :  { %v2458_v61 = vadd.f32 %v2457_v57, %v2456_v55  ;;  %v2437_v63 = vadd.f32 %v2436_v58, %v2435_v56 }
 0x370   :  { %v2459_v0 = vrot.slane %v2458_v61, 1  ;;  %v2438_v1 = vrot.slane %v2437_v63, 1 }
 0x372   :  { %v2460_v2 = vadd.f32 %v2459_v0, %v2458_v61  ;;  %v2439_v5 = vadd.f32 %v2438_v1, %v2437_v63 }
 0x374   :  { %v2755_v10 = vmul.f32 -1.442695, %v2460_v2  ;;  %v2754_v11 = vmul.f32 -1.442695, %v2439_v5 }
 0x376   :  { %3340 = vpow2.f32 %v2755_v10 }
 0x377   :  { %3342 = vpow2.f32 %v2754_v11 }
 0x380   :  { %v3341_v13 = vpop.eup %3340 }
 0x381   :  { %v3343_v14 = vpop.eup %3342  ;;  %v2464_v17 = vadd.f32 1.0, %v3341_v13 }
 0x382   :  { %v2443_v19 = vadd.f32 1.0, %v3343_v14 }
 0x383   :  { %3344 = vrcp.f32 %v2464_v17 }
 0x384   :  { %3346 = vrcp.f32 %v2443_v19 }
 0x38d   :  { %v3345_v20 = vpop.eup %3344 }
 0x38e   :  { %v3347_v21 = vpop.eup %3346  ;;  %2467 = vst.msk [vmem:[%s4099_s6 + $0x1] sm:$0x1] %vm2446_vm9, %v3345_v20 }
 0x38f   :  { %2447 = vst.msk [vmem:[%s4099_s6] sm:$0x1] %vm2446_vm9, %v3347_v21 }

</bundles_post_ra>
